<compile_context>
chip_gen: v7x
topology: tpu7x:2x2x1
jax: 0.10.0
libtpu: 0.0.40
codegen_flags: <defaults>
</compile_context>

<pallas_src>
import jax
import jax.numpy as jnp
from jax.experimental import pallas as pl
from jax.experimental.pallas import tpu as pltpu

_MXU_MIN_C = 32  # below this the 1x1 conv runs on the VPU instead of the MXU


def _separable_conv_kernel(x_ref, halo_ref, dw_w_ref, dw_b_ref, pw_w_ref,
                           o_ref, xs_ref):
    # x_ref    : (1, TH, Wp, C)   rows [h*TH, (h+1)*TH) of one image, W-padded
    # halo_ref : (1, 2, Wp, C)    rows h*TH-1 and (h+1)*TH (zeros at the border)
    # dw_w_ref : (3, 3, C)        depthwise weights
    # dw_b_ref : (1, C)           depthwise bias
    # pw_w_ref : (C, Cout)        pointwise (1x1) weights
    # o_ref    : (1, TH, W, Cout)
    # xs_ref   : (TH+2, Wp, C) f32 scratch: tile plus its top/bottom halo rows
    TH = o_ref.shape[1]
    W = o_ref.shape[2]
    Cout = o_ref.shape[3]
    C = x_ref.shape[3]
    f32 = jnp.float32

    # Assemble the vertically-haloed tile in VMEM scratch (leading-axis row
    # writes only, no sublane/lane relayout).
    xs_ref[0] = halo_ref[0, 0].astype(f32)          # original row h*TH - 1
    xs_ref[1:TH + 1] = x_ref[0].astype(f32)         # rows h*TH .. h*TH + TH - 1
    xs_ref[TH + 1] = halo_ref[0, 1].astype(f32)     # original row (h+1)*TH
    xs = xs_ref[...]                                # (TH+2, Wp, C)

    w = dw_w_ref[...].astype(f32)                   # (3, 3, C)

    # Depthwise 3x3: the vertical (kh) reduction uses only aligned leading-axis
    # row slices; the horizontal (kw) taps become 3 W-slices of the row sums
    # instead of 9 shifted slices of the full tile.
    s = []
    for kw in range(3):
        t = xs[0:TH] * w[0, kw]
        t = t + xs[1:TH + 1] * w[1, kw]
        t = t + xs[2:TH + 2] * w[2, kw]
        s.append(t)                                 # (TH, Wp, C)

    # Accumulator starts from the broadcast depthwise bias (no zeros+add pass).
    bias = dw_b_ref[0].astype(f32)                  # (C,)
    acc = jnp.broadcast_to(bias[None, None, :], (TH, W, C))
    acc = acc + s[0][:, 0:W] + s[1][:, 1:W + 1] + s[2][:, 2:W + 2]

    # Pointwise 1x1 conv.
    pw = pw_w_ref[...].astype(f32)                  # (C, Cout)
    if C >= _MXU_MIN_C:
        # Explicit 2-D (M, K) x (K, N) MXU matmul, M = TH*W rows, f32 accumulate.
        y = jnp.dot(acc.reshape(TH * W, C), pw, preferred_element_type=f32)
        y = y.reshape(TH, W, Cout)
    else:
        # Tiny C (e.g. C=4): the MXU would be almost entirely idle, so run the
        # channel contraction as VPU multiply-adds instead.
        y = acc[:, :, 0:1] * pw[0][None, None, :]
        for c in range(1, C):
            y = y + acc[:, :, c:c + 1] * pw[c][None, None, :]

    o_ref[0] = y.astype(o_ref.dtype)


def separable_conv2d(x_nchw, dw_w, dw_b, pw_w, *, tile_h=8,
                     vmem_limit_bytes=48 * 1024 * 1024):
    """x_nchw: (N, C, H, W); dw_w: (3, 3, C); dw_b: (C,); pw_w: (C, Cout)."""
    N, C, H, W = x_nchw.shape
    KH, KW = dw_w.shape[0], dw_w.shape[1]
    assert (KH, KW) == (3, 3), "only the 3x3 depthwise default is implemented"
    Cout = pw_w.shape[1]

    # Largest divisor of H that is <= tile_h, so H tiles evenly (worst case 1).
    th = max(d for d in range(1, min(tile_h, H) + 1) if H % d == 0)
    nt = H // th
    Wp = W + 2

    # NCHW -> NHWC so channels ride the TPU lane axis; pad W once.  Under jit the
    # transpose + pad fuse into a single producer pass; the H halo is handled by
    # the small side array below instead of padding/copying the full activation.
    x = jnp.transpose(x_nchw, (0, 2, 3, 1))                         # (N, H, W, C)
    x_main = jnp.pad(x, ((0, 0), (0, 0), (1, 1), (0, 0)))           # (N, H, Wp, C)

    # Per-tile halo rows: for H-tile h, original rows h*th-1 and (h+1)*th, with
    # explicit zero rows at the image border.  Shape (N, 2*nt, Wp, C): ~2/th of
    # the input, produced by strided slices that XLA fuses.
    xp = jnp.pad(x, ((0, 0), (1, 1), (1, 1), (0, 0)))               # (N, H+2, Wp, C)
    top = xp[:, 0:H:th]                                             # (N, nt, Wp, C)
    bot = xp[:, th + 1::th]                                         # (N, nt, Wp, C)
    halo = jnp.stack([top, bot], axis=2).reshape(N, 2 * nt, Wp, C)

    dw_b2 = dw_b.reshape(1, C)

    out_nhwc = pl.pallas_call(
        _separable_conv_kernel,
        out_shape=jax.ShapeDtypeStruct((N, H, W, Cout), x_nchw.dtype),
        grid_spec=pltpu.PrefetchScalarGridSpec(
            num_scalar_prefetch=0,
            grid=(N, nt),
            in_specs=[
                pl.BlockSpec((1, th, Wp, C), lambda n, h: (n, h, 0, 0)),
                pl.BlockSpec((1, 2, Wp, C), lambda n, h: (n, h, 0, 0)),
                pl.BlockSpec((KH, KW, C), lambda n, h: (0, 0, 0)),
                pl.BlockSpec((1, C), lambda n, h: (0, 0)),
                pl.BlockSpec((C, Cout), lambda n, h: (0, 0)),
            ],
            out_specs=pl.BlockSpec((1, th, W, Cout), lambda n, h: (n, h, 0, 0)),
            scratch_shapes=[pltpu.VMEM((th + 2, Wp, C), jnp.float32)],
        ),
        compiler_params=pltpu.CompilerParams(
            # Both grid axes are independent -> megacore / 2-TC sharding on v7x.
            dimension_semantics=("parallel", "parallel"),
            # Above the 16/32 MiB scoped defaults (v5e/v6e), below v7x's 64 MiB.
            vmem_limit_bytes=vmem_limit_bytes,
        ),
    )(x_main, halo, dw_w, dw_b2, pw_w)

    return jnp.transpose(out_nhwc, (0, 3, 1, 2))                    # back to NCHW


def _reference(x_nchw, dw_w, dw_b, pw_w):
    """Pure-JAX reference using lax.conv_general_dilated (NCHW)."""
    C = x_nchw.shape[1]
    w_dw = jnp.transpose(dw_w, (2, 0, 1))[:, None, :, :]            # (C,1,KH,KW)
    y = jax.lax.conv_general_dilated(
        x_nchw, w_dw, window_strides=(1, 1), padding=((1, 1), (1, 1)),
        feature_group_count=C,
        dimension_numbers=('NCHW', 'OIHW', 'NCHW'),
        precision=jax.lax.Precision.HIGHEST)
    y = y + dw_b[None, :, None, None]
    w_pw = jnp.transpose(pw_w, (1, 0))[:, :, None, None]            # (Cout,C,1,1)
    y = jax.lax.conv_general_dilated(
        y, w_pw, window_strides=(1, 1), padding=((0, 0), (0, 0)),
        dimension_numbers=('NCHW', 'OIHW', 'NCHW'),
        precision=jax.lax.Precision.HIGHEST)
    return y


if __name__ == "__main__":
    keys = jax.random.split(jax.random.PRNGKey(0), 8)
    fn = jax.jit(separable_conv2d)

    # --- Config 1: module defaults at the small test shape (tiny C -> VPU
    # pointwise path; H=16 splits into 2 slabs of TH=8 -> grid=(2, 2)). ---
    N, C_in, H, W = 2, 4, 16, 16
    C_out = 8
    x = jax.random.normal(keys[0], (N, C_in, H, W), dtype=jnp.float32)
    dw_w = jax.random.normal(keys[1], (3, 3, C_in), dtype=jnp.float32) * (1.0 / 3.0)
    dw_b = jax.random.normal(keys[2], (C_in,), dtype=jnp.float32) * 0.1
    pw_w = jax.random.normal(keys[3], (C_in, C_out), dtype=jnp.float32) * (1.0 / C_in ** 0.5)

    out = jax.block_until_ready(fn(x, dw_w, dw_b, pw_w))
    ref = _reference(x, dw_w, dw_b, pw_w)
    assert out.shape == (N, C_out, H, W), out.shape
    assert jnp.allclose(out, ref, rtol=1e-4, atol=1e-4), "mismatch (VPU pointwise path)"

    # --- Config 2: wider channels -> exercises the MXU (2-D matmul) pointwise
    # path.  Looser tolerance: the f32 MXU matmul may use bf16 passes. ---
    N2, C2, H2, W2, Co2 = 1, 32, 8, 16, 32
    x2 = jax.random.normal(keys[4], (N2, C2, H2, W2), dtype=jnp.float32)
    dw_w2 = jax.random.normal(keys[5], (3, 3, C2), dtype=jnp.float32) * (1.0 / 3.0)
    dw_b2 = jax.random.normal(keys[6], (C2,), dtype=jnp.float32) * 0.1
    pw_w2 = jax.random.normal(keys[7], (C2, Co2), dtype=jnp.float32) * (1.0 / C2 ** 0.5)

    out2 = jax.block_until_ready(fn(x2, dw_w2, dw_b2, pw_w2))
    ref2 = _reference(x2, dw_w2, dw_b2, pw_w2)
    assert out2.shape == (N2, Co2, H2, W2), out2.shape
    assert jnp.allclose(out2, ref2, rtol=2e-2, atol=2e-2), "mismatch (MXU pointwise path)"

    print("KERNEL_OK")
</pallas_src>

<mosaic_0001>
module attributes {stable_mosaic.version = 11 : i64} {
  func.func @_separable_conv_kernel(%arg0: i32, %arg1: i32, %arg2: memref<1x8x18x4xf32, #tpu.memory_space<vmem>>, %arg3: memref<1x2x18x4xf32, #tpu.memory_space<vmem>>, %arg4: memref<3x3x4xf32, #tpu.memory_space<vmem>>, %arg5: memref<1x4xf32, #tpu.memory_space<vmem>>, %arg6: memref<4x8xf32, #tpu.memory_space<vmem>>, %arg7: memref<1x8x16x8xf32, #tpu.memory_space<vmem>>, %arg8: memref<10x18x4xf32, #tpu.memory_space<vmem>>) attributes {dimension_semantics = [#tpu.dimension_semantics<parallel>, #tpu.dimension_semantics<parallel>], iteration_bounds = array<i64: 2, 2>, scalar_prefetch = 0 : i64, scratch_operands = 1 : i64, tpu.core_type = #tpu.core_type<tc>, window_params = [{transform_indices = @transform_0, window_bounds = array<i64: 1, 8, 18, 4>}, {transform_indices = @transform_1, window_bounds = array<i64: 1, 2, 18, 4>}, {pipeline_mode = #tpu.pipeline_mode<synchronous>, transform_indices = @transform_2, window_bounds = array<i64: 3, 3, 4>}, {pipeline_mode = #tpu.pipeline_mode<synchronous>, transform_indices = @transform_3, window_bounds = array<i64: 1, 4>}, {pipeline_mode = #tpu.pipeline_mode<synchronous>, transform_indices = @transform_4, window_bounds = array<i64: 4, 8>}, {transform_indices = @transform_5, window_bounds = array<i64: 1, 8, 16, 8>}]} {
    %c0 = arith.constant 0 : index
    %c0_0 = arith.constant 0 : index
    %c0_1 = arith.constant 0 : index
    %c0_2 = arith.constant 0 : index
    %0 = vector.load %arg3[%c0, %c0_0, %c0_1, %c0_2] : memref<1x2x18x4xf32, #tpu.memory_space<vmem>>, vector<1x1x18x4xf32>
    %1 = vector.shape_cast %0 : vector<1x1x18x4xf32> to vector<18x4xf32>
    %c0_3 = arith.constant 0 : index
    %c0_4 = arith.constant 0 : index
    %c0_5 = arith.constant 0 : index
    %2 = vector.load %arg8[%c0_3, %c0_4, %c0_5] : memref<10x18x4xf32, #tpu.memory_space<vmem>>, vector<1x18x4xf32>
    %3 = vector.shape_cast %2 : vector<1x18x4xf32> to vector<18x4xf32>
    %4 = vector.shape_cast %1 : vector<18x4xf32> to vector<1x18x4xf32>
    tpu.vector_store %arg8[%c0_3, %c0_4, %c0_5], %4 {strides = array<i32>} : memref<10x18x4xf32, #tpu.memory_space<vmem>>, vector<1x18x4xf32>,
    %c0_6 = arith.constant 0 : index
    %c0_7 = arith.constant 0 : index
    %c0_8 = arith.constant 0 : index
    %c0_9 = arith.constant 0 : index
    %5 = vector.load %arg2[%c0_6, %c0_7, %c0_8, %c0_9] : memref<1x8x18x4xf32, #tpu.memory_space<vmem>>, vector<1x8x18x4xf32>
    %6 = vector.shape_cast %5 : vector<1x8x18x4xf32> to vector<8x18x4xf32>
    %c1 = arith.constant 1 : index
    %c0_10 = arith.constant 0 : index
    %c0_11 = arith.constant 0 : index
    %7 = vector.load %arg8[%c1, %c0_10, %c0_11] : memref<10x18x4xf32, #tpu.memory_space<vmem>>, vector<8x18x4xf32>
    tpu.vector_store %arg8[%c1, %c0_10, %c0_11], %6 {strides = array<i32>} : memref<10x18x4xf32, #tpu.memory_space<vmem>>, vector<8x18x4xf32>,
    %c0_12 = arith.constant 0 : index
    %c1_13 = arith.constant 1 : index
    %c0_14 = arith.constant 0 : index
    %c0_15 = arith.constant 0 : index
    %8 = vector.load %arg3[%c0_12, %c1_13, %c0_14, %c0_15] : memref<1x2x18x4xf32, #tpu.memory_space<vmem>>, vector<1x1x18x4xf32>
    %9 = vector.shape_cast %8 : vector<1x1x18x4xf32> to vector<18x4xf32>
    %c9 = arith.constant 9 : index
    %c0_16 = arith.constant 0 : index
    %c0_17 = arith.constant 0 : index
    %10 = vector.load %arg8[%c9, %c0_16, %c0_17] : memref<10x18x4xf32, #tpu.memory_space<vmem>>, vector<1x18x4xf32>
    %11 = vector.shape_cast %10 : vector<1x18x4xf32> to vector<18x4xf32>
    %12 = vector.shape_cast %9 : vector<18x4xf32> to vector<1x18x4xf32>
    tpu.vector_store %arg8[%c9, %c0_16, %c0_17], %12 {strides = array<i32>} : memref<10x18x4xf32, #tpu.memory_space<vmem>>, vector<1x18x4xf32>,
    %c0_18 = arith.constant 0 : index
    %c0_19 = arith.constant 0 : index
    %c0_20 = arith.constant 0 : index
    %13 = vector.load %arg8[%c0_18, %c0_19, %c0_20] : memref<10x18x4xf32, #tpu.memory_space<vmem>>, vector<10x18x4xf32>
    %c0_21 = arith.constant 0 : index
    %c0_22 = arith.constant 0 : index
    %c0_23 = arith.constant 0 : index
    %14 = vector.load %arg4[%c0_21, %c0_22, %c0_23] : memref<3x3x4xf32, #tpu.memory_space<vmem>>, vector<3x3x4xf32>
    %15 = vector.extract_strided_slice %13 {offsets = [0, 0, 0], sizes = [8, 18, 4], strides = [1, 1, 1]} : vector<10x18x4xf32> to vector<8x18x4xf32>
    %16 = vector.extract_strided_slice %14 {offsets = [0, 0, 0], sizes = [1, 1, 4], strides = [1, 1, 1]} : vector<3x3x4xf32> to vector<1x1x4xf32>
    %17 = vector.shape_cast %16 : vector<1x1x4xf32> to vector<4xf32>
    %18 = vector.shape_cast %17 : vector<4xf32> to vector<1x1x4xf32>
    %19 = vector.broadcast %18 : vector<1x1x4xf32> to vector<8x18x4xf32>
    %20 = arith.mulf %15, %19 : vector<8x18x4xf32>
    %21 = vector.extract_strided_slice %13 {offsets = [1, 0, 0], sizes = [8, 18, 4], strides = [1, 1, 1]} : vector<10x18x4xf32> to vector<8x18x4xf32>
    %22 = vector.extract_strided_slice %14 {offsets = [1, 0, 0], sizes = [1, 1, 4], strides = [1, 1, 1]} : vector<3x3x4xf32> to vector<1x1x4xf32>
    %23 = vector.shape_cast %22 : vector<1x1x4xf32> to vector<4xf32>
    %24 = vector.shape_cast %23 : vector<4xf32> to vector<1x1x4xf32>
    %25 = vector.broadcast %24 : vector<1x1x4xf32> to vector<8x18x4xf32>
    %26 = arith.mulf %21, %25 : vector<8x18x4xf32>
    %27 = arith.addf %20, %26 : vector<8x18x4xf32>
    %28 = vector.extract_strided_slice %13 {offsets = [2, 0, 0], sizes = [8, 18, 4], strides = [1, 1, 1]} : vector<10x18x4xf32> to vector<8x18x4xf32>
    %29 = vector.extract_strided_slice %14 {offsets = [2, 0, 0], sizes = [1, 1, 4], strides = [1, 1, 1]} : vector<3x3x4xf32> to vector<1x1x4xf32>
    %30 = vector.shape_cast %29 : vector<1x1x4xf32> to vector<4xf32>
    %31 = vector.shape_cast %30 : vector<4xf32> to vector<1x1x4xf32>
    %32 = vector.broadcast %31 : vector<1x1x4xf32> to vector<8x18x4xf32>
    %33 = arith.mulf %28, %32 : vector<8x18x4xf32>
    %34 = arith.addf %27, %33 : vector<8x18x4xf32>
    %35 = vector.extract_strided_slice %13 {offsets = [0, 0, 0], sizes = [8, 18, 4], strides = [1, 1, 1]} : vector<10x18x4xf32> to vector<8x18x4xf32>
    %36 = vector.extract_strided_slice %14 {offsets = [0, 1, 0], sizes = [1, 1, 4], strides = [1, 1, 1]} : vector<3x3x4xf32> to vector<1x1x4xf32>
    %37 = vector.shape_cast %36 : vector<1x1x4xf32> to vector<4xf32>
    %38 = vector.shape_cast %37 : vector<4xf32> to vector<1x1x4xf32>
    %39 = vector.broadcast %38 : vector<1x1x4xf32> to vector<8x18x4xf32>
    %40 = arith.mulf %35, %39 : vector<8x18x4xf32>
    %41 = vector.extract_strided_slice %13 {offsets = [1, 0, 0], sizes = [8, 18, 4], strides = [1, 1, 1]} : vector<10x18x4xf32> to vector<8x18x4xf32>
    %42 = vector.extract_strided_slice %14 {offsets = [1, 1, 0], sizes = [1, 1, 4], strides = [1, 1, 1]} : vector<3x3x4xf32> to vector<1x1x4xf32>
    %43 = vector.shape_cast %42 : vector<1x1x4xf32> to vector<4xf32>
    %44 = vector.shape_cast %43 : vector<4xf32> to vector<1x1x4xf32>
    %45 = vector.broadcast %44 : vector<1x1x4xf32> to vector<8x18x4xf32>
    %46 = arith.mulf %41, %45 : vector<8x18x4xf32>
    %47 = arith.addf %40, %46 : vector<8x18x4xf32>
    %48 = vector.extract_strided_slice %13 {offsets = [2, 0, 0], sizes = [8, 18, 4], strides = [1, 1, 1]} : vector<10x18x4xf32> to vector<8x18x4xf32>
    %49 = vector.extract_strided_slice %14 {offsets = [2, 1, 0], sizes = [1, 1, 4], strides = [1, 1, 1]} : vector<3x3x4xf32> to vector<1x1x4xf32>
    %50 = vector.shape_cast %49 : vector<1x1x4xf32> to vector<4xf32>
    %51 = vector.shape_cast %50 : vector<4xf32> to vector<1x1x4xf32>
    %52 = vector.broadcast %51 : vector<1x1x4xf32> to vector<8x18x4xf32>
    %53 = arith.mulf %48, %52 : vector<8x18x4xf32>
    %54 = arith.addf %47, %53 : vector<8x18x4xf32>
    %55 = vector.extract_strided_slice %13 {offsets = [0, 0, 0], sizes = [8, 18, 4], strides = [1, 1, 1]} : vector<10x18x4xf32> to vector<8x18x4xf32>
    %56 = vector.extract_strided_slice %14 {offsets = [0, 2, 0], sizes = [1, 1, 4], strides = [1, 1, 1]} : vector<3x3x4xf32> to vector<1x1x4xf32>
    %57 = vector.shape_cast %56 : vector<1x1x4xf32> to vector<4xf32>
    %58 = vector.shape_cast %57 : vector<4xf32> to vector<1x1x4xf32>
    %59 = vector.broadcast %58 : vector<1x1x4xf32> to vector<8x18x4xf32>
    %60 = arith.mulf %55, %59 : vector<8x18x4xf32>
    %61 = vector.extract_strided_slice %13 {offsets = [1, 0, 0], sizes = [8, 18, 4], strides = [1, 1, 1]} : vector<10x18x4xf32> to vector<8x18x4xf32>
    %62 = vector.extract_strided_slice %14 {offsets = [1, 2, 0], sizes = [1, 1, 4], strides = [1, 1, 1]} : vector<3x3x4xf32> to vector<1x1x4xf32>
    %63 = vector.shape_cast %62 : vector<1x1x4xf32> to vector<4xf32>
    %64 = vector.shape_cast %63 : vector<4xf32> to vector<1x1x4xf32>
    %65 = vector.broadcast %64 : vector<1x1x4xf32> to vector<8x18x4xf32>
    %66 = arith.mulf %61, %65 : vector<8x18x4xf32>
    %67 = arith.addf %60, %66 : vector<8x18x4xf32>
    %68 = vector.extract_strided_slice %13 {offsets = [2, 0, 0], sizes = [8, 18, 4], strides = [1, 1, 1]} : vector<10x18x4xf32> to vector<8x18x4xf32>
    %69 = vector.extract_strided_slice %14 {offsets = [2, 2, 0], sizes = [1, 1, 4], strides = [1, 1, 1]} : vector<3x3x4xf32> to vector<1x1x4xf32>
    %70 = vector.shape_cast %69 : vector<1x1x4xf32> to vector<4xf32>
    %71 = vector.shape_cast %70 : vector<4xf32> to vector<1x1x4xf32>
    %72 = vector.broadcast %71 : vector<1x1x4xf32> to vector<8x18x4xf32>
    %73 = arith.mulf %68, %72 : vector<8x18x4xf32>
    %74 = arith.addf %67, %73 : vector<8x18x4xf32>
    %c0_24 = arith.constant 0 : index
    %c0_25 = arith.constant 0 : index
    %75 = vector.load %arg5[%c0_24, %c0_25] : memref<1x4xf32, #tpu.memory_space<vmem>>, vector<1x4xf32>
    %76 = vector.shape_cast %75 : vector<1x4xf32> to vector<4xf32>
    %77 = vector.shape_cast %76 : vector<4xf32> to vector<1x1x4xf32>
    %78 = vector.shape_cast %77 : vector<1x1x4xf32> to vector<1x1x4xf32>
    %79 = vector.broadcast %78 : vector<1x1x4xf32> to vector<8x16x4xf32>
    %80 = vector.extract_strided_slice %34 {offsets = [0, 0, 0], sizes = [8, 16, 4], strides = [1, 1, 1]} : vector<8x18x4xf32> to vector<8x16x4xf32>
    %81 = arith.addf %79, %80 : vector<8x16x4xf32>
    %82 = vector.extract_strided_slice %54 {offsets = [0, 1, 0], sizes = [8, 16, 4], strides = [1, 1, 1]} : vector<8x18x4xf32> to vector<8x16x4xf32>
    %83 = arith.addf %81, %82 : vector<8x16x4xf32>
    %84 = vector.extract_strided_slice %74 {offsets = [0, 2, 0], sizes = [8, 16, 4], strides = [1, 1, 1]} : vector<8x18x4xf32> to vector<8x16x4xf32>
    %85 = arith.addf %83, %84 : vector<8x16x4xf32>
    %c0_26 = arith.constant 0 : index
    %c0_27 = arith.constant 0 : index
    %86 = vector.load %arg6[%c0_26, %c0_27] : memref<4x8xf32, #tpu.memory_space<vmem>>, vector<4x8xf32>
    %87 = vector.extract_strided_slice %85 {offsets = [0, 0, 0], sizes = [8, 16, 1], strides = [1, 1, 1]} : vector<8x16x4xf32> to vector<8x16x1xf32>
    %88 = vector.extract_strided_slice %86 {offsets = [0, 0], sizes = [1, 8], strides = [1, 1]} : vector<4x8xf32> to vector<1x8xf32>
    %89 = vector.shape_cast %88 : vector<1x8xf32> to vector<8xf32>
    %90 = vector.shape_cast %89 : vector<8xf32> to vector<1x1x8xf32>
    %91 = vector.broadcast %87 : vector<8x16x1xf32> to vector<8x16x8xf32>
    %92 = vector.broadcast %90 : vector<1x1x8xf32> to vector<8x16x8xf32>
    %93 = arith.mulf %91, %92 : vector<8x16x8xf32>
    %94 = vector.extract_strided_slice %85 {offsets = [0, 0, 1], sizes = [8, 16, 1], strides = [1, 1, 1]} : vector<8x16x4xf32> to vector<8x16x1xf32>
    %95 = vector.extract_strided_slice %86 {offsets = [1, 0], sizes = [1, 8], strides = [1, 1]} : vector<4x8xf32> to vector<1x8xf32>
    %96 = vector.shape_cast %95 : vector<1x8xf32> to vector<8xf32>
    %97 = vector.shape_cast %96 : vector<8xf32> to vector<1x1x8xf32>
    %98 = vector.broadcast %94 : vector<8x16x1xf32> to vector<8x16x8xf32>
    %99 = vector.broadcast %97 : vector<1x1x8xf32> to vector<8x16x8xf32>
    %100 = arith.mulf %98, %99 : vector<8x16x8xf32>
    %101 = arith.addf %93, %100 : vector<8x16x8xf32>
    %102 = vector.extract_strided_slice %85 {offsets = [0, 0, 2], sizes = [8, 16, 1], strides = [1, 1, 1]} : vector<8x16x4xf32> to vector<8x16x1xf32>
    %103 = vector.extract_strided_slice %86 {offsets = [2, 0], sizes = [1, 8], strides = [1, 1]} : vector<4x8xf32> to vector<1x8xf32>
    %104 = vector.shape_cast %103 : vector<1x8xf32> to vector<8xf32>
    %105 = vector.shape_cast %104 : vector<8xf32> to vector<1x1x8xf32>
    %106 = vector.broadcast %102 : vector<8x16x1xf32> to vector<8x16x8xf32>
    %107 = vector.broadcast %105 : vector<1x1x8xf32> to vector<8x16x8xf32>
    %108 = arith.mulf %106, %107 : vector<8x16x8xf32>
    %109 = arith.addf %101, %108 : vector<8x16x8xf32>
    %110 = vector.extract_strided_slice %85 {offsets = [0, 0, 3], sizes = [8, 16, 1], strides = [1, 1, 1]} : vector<8x16x4xf32> to vector<8x16x1xf32>
    %111 = vector.extract_strided_slice %86 {offsets = [3, 0], sizes = [1, 8], strides = [1, 1]} : vector<4x8xf32> to vector<1x8xf32>
    %112 = vector.shape_cast %111 : vector<1x8xf32> to vector<8xf32>
    %113 = vector.shape_cast %112 : vector<8xf32> to vector<1x1x8xf32>
    %114 = vector.broadcast %110 : vector<8x16x1xf32> to vector<8x16x8xf32>
    %115 = vector.broadcast %113 : vector<1x1x8xf32> to vector<8x16x8xf32>
    %116 = arith.mulf %114, %115 : vector<8x16x8xf32>
    %117 = arith.addf %109, %116 : vector<8x16x8xf32>
    %c0_28 = arith.constant 0 : index
    %c0_29 = arith.constant 0 : index
    %c0_30 = arith.constant 0 : index
    %c0_31 = arith.constant 0 : index
    %118 = vector.load %arg7[%c0_28, %c0_29, %c0_30, %c0_31] : memref<1x8x16x8xf32, #tpu.memory_space<vmem>>, vector<1x8x16x8xf32>
    %119 = vector.shape_cast %118 : vector<1x8x16x8xf32> to vector<8x16x8xf32>
    %120 = vector.shape_cast %117 : vector<8x16x8xf32> to vector<1x8x16x8xf32>
    tpu.vector_store %arg7[%c0_28, %c0_29, %c0_30, %c0_31], %120 {strides = array<i32>} : memref<1x8x16x8xf32, #tpu.memory_space<vmem>>, vector<1x8x16x8xf32>,
    return
  }
  func.func @transform_0(%arg0: i32, %arg1: i32) -> (i32, i32, i32, i32) {
    %c0_i32 = arith.constant 0 : i32
    %c0_i32_0 = arith.constant 0 : i32
    %c0_i32_1 = arith.constant 0 : i32
    return %arg0, %arg1, %c0_i32, %c0_i32_0 : i32, i32, i32, i32
  }
  func.func @transform_1(%arg0: i32, %arg1: i32) -> (i32, i32, i32, i32) {
    %c0_i32 = arith.constant 0 : i32
    %c0_i32_0 = arith.constant 0 : i32
    %c0_i32_1 = arith.constant 0 : i32
    return %arg0, %arg1, %c0_i32, %c0_i32_0 : i32, i32, i32, i32
  }
  func.func @transform_2(%arg0: i32, %arg1: i32) -> (i32, i32, i32) {
    %c0_i32 = arith.constant 0 : i32
    %c0_i32_0 = arith.constant 0 : i32
    %c0_i32_1 = arith.constant 0 : i32
    %c0_i32_2 = arith.constant 0 : i32
    return %c0_i32, %c0_i32_0, %c0_i32_1 : i32, i32, i32
  }
  func.func @transform_3(%arg0: i32, %arg1: i32) -> (i32, i32) {
    %c0_i32 = arith.constant 0 : i32
    %c0_i32_0 = arith.constant 0 : i32
    %c0_i32_1 = arith.constant 0 : i32
    return %c0_i32, %c0_i32_0 : i32, i32
  }
  func.func @transform_4(%arg0: i32, %arg1: i32) -> (i32, i32) {
    %c0_i32 = arith.constant 0 : i32
    %c0_i32_0 = arith.constant 0 : i32
    %c0_i32_1 = arith.constant 0 : i32
    return %c0_i32, %c0_i32_0 : i32, i32
  }
  func.func @transform_5(%arg0: i32, %arg1: i32) -> (i32, i32, i32, i32) {
    %c0_i32 = arith.constant 0 : i32
    %c0_i32_0 = arith.constant 0 : i32
    %c0_i32_1 = arith.constant 0 : i32
    return %arg0, %arg1, %c0_i32, %c0_i32_0 : i32, i32, i32, i32
  }
}

</mosaic_0001>

<bundles_post_ra>
// kernel: separable_conv2d.1
= control target key start
LH: loop header
LB: loop body
LE: loop exit
PB: predicated region body
PF: predicated region fallthrough
CT: control target
= control target key end

     0   :  { %s1666_s18 = smov 0   ;;  %s1668_s19 = smov 0   ;;  %s2629_s0 = inlined_call_operand.vmem [shape: f32[2,16,18,4], index: 0, kind: input, shape index: {}]   ;;  %s2630_s1 = inlined_call_operand.vmem [shape: f32[2,4,18,4], index: 1, kind: input, shape index: {}]   ;;  %s2631_s2 = inlined_call_operand.vmem [shape: f32[3,3,4], index: 2, kind: input, shape index: {}]   ;;  %s2632_s3 = inlined_call_operand.vmem [shape: f32[1,4], index: 3, kind: input, shape index: {}]   ;;  %s2633_s4 = inlined_call_operand.vmem [shape: f32[4,8], index: 4, kind: input, shape index: {}]   ;;  %s2634_s5 = inlined_call_operand.vmem [shape: f32[2,16,16,8], index: 5, kind: output, shape index: {}]  }
   0x1   :  { %s1670_s20 = smov 0   ;;  %s1672_s21 = smov 0  }
   0x2   :  { %s1674_s22 = smov 0  }
   0x3 LB: > { %s24_s23 = sadd.s32 1, %s1622_s20  ;;  %s27_s24 = sadd.s32 1, %s1626_s21  ;;  %s1630_s22 = sphi %s1674_s22, %s15_s22   ;;  %s1626_s21 = sphi %s1672_s21, %s2638_s21   ;;  %s1622_s20 = sphi %s1670_s20, %s2637_s20   ;;  %s1618_s19 = sphi %s1668_s19, %s2636_s19   ;;  %s1614_s18 = sphi %s1666_s18, %s2635_s18  }
   0x4   : > { %p25_p0 = scmp.ge.s32.totalorder %s24_s23, 2  ;;  %p1521_p1 = scmp.ge.s32.totalorder %s1630_s22, 1 }
   0x5   : > { %p227_p2 = scmp.lt.s32.totalorder %s1630_s22, 5 }
   0x6   : > { %s2640_s23 = smov (%p25_p0, %s24_s23), 0  ;;  %s2642_s24 = smov (!%p25_p0, %s27_s24), %s1626_s21 }
   0x7   : > { %p228_p3 = pnand %p1521_p1, %p227_p2  ;;  %p29_p4 = scmp.ge.s32.totalorder %s2642_s24, 2 }
   0x8   : > { %s1522_s25 = sshll.u32 (!%p228_p3), %s1614_s18, 3  ;;  %p276_p5 = scmp.lt.s32.totalorder (!%p228_p3), %s1618_s19, 1  ;;  %v1632_v0 = vmov (!%p228_p3), 0   ;;  %v406_v1 = vlaneseq (!%p228_p3)  ;;  %vm311_vm0 = vcmask (!%p228_p3), 31744   ;;  %v404_v6 = vld [vmem:[%s2631_s2 + $0x4] sm:$0x7] (!%p228_p3) }
   0x9   : > { %s2644_s24 = smov (%p29_p4, %s2642_s24), 0  ;;  %231 = sbr.rel (%p228_p3) target bundleno = 389 (0x185), region = 40 }
   0xa   : > { %1585 = vset.pattern.permute.xlu1 (!%p228_p3), %v1632_v0  ;;  %1584 = vset.pattern.permute.xlu0 (!%p228_p3), %v1632_v0  ;;  %p278_p6 = scmp.lt.s32.totalorder (!%p228_p3), %s1522_s25, 15  ;;  %s1524_s26 = sshll.u32 (!%p228_p3), %s1614_s18, 1  ;;  %v1706_v2 = vshrl.u32 (!%p228_p3), %v406_v1, 7  ;;  %v405_v7 = vld [vmem:[%s2631_s2 + $0x8] sm:$0x7] (!%p228_p3)  ;;  %vm314_vm1 = vcmask (!%p228_p3), 25600  }
   0xb   : > { %p289_p7 = scmp.lt.s32.totalorder (!%p228_p3), %s1524_s26, 3  ;;  %v403_v14 = vld [vmem:[%s2631_s2] sm:$0x7] (!%p228_p3)  ;;  %vm809_vm2 = vcmask (!%p228_p3), 1046528   ;;  %vm906_vm3 = vcmask (!%p228_p3), 1045504   ;;  %vm1380_vm4 = vcmask (!%p228_p3), 64512  }
   0xc   : > { %v1724_v8 = vsub.s32 (!%p228_p3), 0, %v1706_v2  ;;  %v1731_v10 = vsub.s32 (!%p228_p3), 1, %v1706_v2  ;;  %v1734_v11 = vsub.s32 (!%p228_p3), 2, %v1706_v2 }
   0xe   : > { %v1765_v24 = vrot.slane (!%p228_p3), %v404_v6, %v1724_v8  ;;  %v1768_v25 = vrot.slane (!%p228_p3), %v405_v7, %v1724_v8  ;;  %v1771_v26 = vrot.slane (!%p228_p3), %v404_v6, %v1731_v10  ;;  %v1780_v30 = vrot.slane (!%p228_p3), %v405_v7, %v1731_v10 }
   0xf   : > { %v1783_v31 = vrot.slane (!%p228_p3), %v404_v6, %v1734_v11  ;;  %v1792_v35 = vrot.slane (!%p228_p3), %v403_v14, %v1724_v8  ;;  %v1795_v36 = vrot.slane (!%p228_p3), %v405_v7, %v1734_v11  ;;  %v1810_v43 = vrot.slane (!%p228_p3), %v403_v14, %v1731_v10 }
  0x10   : > { %s2646_s19 = smov (!%p276_p5, %s1618_s19), 1  ;;  %s2648_s25 = smov (!%p278_p6, %s1522_s25), 15  ;;  %v1813_v44 = vrot.slane %v403_v14, %v1734_v11  ;;  %v1862_v14 = vld [vmem:[%s2632_s3] ss:$0 sm:$0xff] }
  0x11   : > { %s1537_s27 = smul.u32 48, %s2646_s19  ;;  %s2650_s26 = smov (!%p289_p7, %s1524_s26), 3 }
  0x12   : > { %s1536_s28 = smul.u32 3, %s2648_s25  ;;  %s1527_s8 = sshll.u32 %s2648_s25, 1 }
  0x13   : > { %s1539_s30 = smul.u32 12, %s2646_s19  ;;  %s1528_s9 = sshll.u32 %s2646_s19, 5 }
  0x14   : > { %s282_s29 = sadd.s32 %s1537_s27, %s1536_s28  ;;  %s1538_s7 = smul.u32 3, %s2650_s26 }
  0x15   : > { %s1523_s6 = sshll.u32 %s282_s29, 3 }
  0x16   : > { %s1712_s10 = scalar_lea.vmem %s2629_s0, %s1523_s6  ;;  %s293_s11 = sadd.s32 %s1539_s30, %s1538_s7 }
  0x17   : > { %v316_v3 = vld [vmem:[%s1712_s10] sm:$0xff]  ;;  %v317_v4 = vld [vmem:[%s1712_s10 + $0x8] sm:$0xff]  ;;  %v319_v5 = vld [vmem:[%s1712_s10 + $0x18] sm:$0xff]  ;;  %s1525_s16 = sshll.u32 %s293_s11, 3 }
  0x18   : > { %v320_v9 = vld [vmem:[%s1712_s10 + $0x20] sm:$0xff]  ;;  %341 = vst.msk [vmem:[#allocation2 + $0x18] sm:$0xff] %vm311_vm0, %v316_v3  ;;  %342 = vst.msk [vmem:[#allocation2 + $0x20] sm:$0xff] %vm311_vm0, %v317_v4  ;;  %v322_v12 = vld [vmem:[%s1712_s10 + $0x30] sm:$0xff]  ;;  %s1741_s26 = scalar_lea.vmem %s2630_s1, %s1525_s16 }
  0x19   : > { %344 = vst.msk [vmem:[#allocation2 + $0x30] sm:$0xff] %vm311_vm0, %v319_v5  ;;  %v323_v13 = vld [vmem:[%s1712_s10 + $0x38] sm:$0xff]  ;;  %345 = vst.msk [vmem:[#allocation2 + $0x38] sm:$0xff] %vm311_vm0, %v320_v9  ;;  %v318_v15 = vld [vmem:[%s1712_s10 + $0x10] sm:$0x3] }
  0x1a   : > { %347 = vst.msk [vmem:[#allocation2 + $0x48] sm:$0xff] %vm311_vm0, %v322_v12  ;;  %348 = vst.msk [vmem:[#allocation2 + $0x50] sm:$0xff] %vm311_vm0, %v323_v13  ;;  %v321_v16 = vld [vmem:[%s1712_s10 + $0x28] sm:$0x3]  ;;  %v324_v17 = vld [vmem:[%s1712_s10 + $0x40] sm:$0x3] }
  0x1b   : > { %v308_v18 = vld [vmem:[%s1741_s26] sm:$0xff]  ;;  %v309_v19 = vld [vmem:[%s1741_s26 + $0x8] sm:$0xff]  ;;  %v310_v20 = vld [vmem:[%s1741_s26 + $0x10] sm:$0x3]  ;;  %343 = vst.msk [vmem:[#allocation2 + $0x28] sm:$0x3] %vm314_vm1, %v318_v15 }
  0x1c   : > { %346 = vst.msk [vmem:[#allocation2 + $0x40] sm:$0x3] %vm314_vm1, %v321_v16  ;;  %349 = vst.msk [vmem:[#allocation2 + $0x58] sm:$0x3] %vm314_vm1, %v324_v17  ;;  %v325_v21 = vld [vmem:[%s1712_s10 + $0x48] sm:$0xff]  ;;  %v326_v22 = vld [vmem:[%s1712_s10 + $0x50] sm:$0xff] }
  0x1d   : > { %312 = vst.msk [vmem:[#allocation2] sm:$0xff] %vm311_vm0, %v308_v18  ;;  %313 = vst.msk [vmem:[#allocation2 + $0x8] sm:$0xff] %vm311_vm0, %v309_v19  ;;  %v327_v23 = vld [vmem:[%s1712_s10 + $0x58] sm:$0x3]  ;;  %v328_v27 = vld [vmem:[%s1712_s10 + $0x60] sm:$0xff] }
  0x1e   : > { %315 = vst.msk [vmem:[#allocation2 + $0x10] sm:$0x3] %vm314_vm1, %v310_v20  ;;  %352 = vst.msk [vmem:[#allocation2 + $0x70] sm:$0x3] %vm314_vm1, %v327_v23  ;;  %v329_v28 = vld [vmem:[%s1712_s10 + $0x68] sm:$0xff]  ;;  %v331_v32 = vld [vmem:[%s1712_s10 + $0x78] sm:$0xff] }
  0x1f   : > { %350 = vst.msk [vmem:[#allocation2 + $0x60] sm:$0xff] %vm311_vm0, %v325_v21  ;;  %351 = vst.msk [vmem:[#allocation2 + $0x68] sm:$0xff] %vm311_vm0, %v326_v22  ;;  %v330_v29 = vld [vmem:[%s1712_s10 + $0x70] sm:$0x3]  ;;  %v332_v33 = vld [vmem:[%s1712_s10 + $0x80] sm:$0xff] }
  0x20   : > { %353 = vst.msk [vmem:[#allocation2 + $0x78] sm:$0xff] %vm311_vm0, %v328_v27  ;;  %354 = vst.msk [vmem:[#allocation2 + $0x80] sm:$0xff] %vm311_vm0, %v329_v28  ;;  %v333_v34 = vld [vmem:[%s1712_s10 + $0x88] sm:$0x3]  ;;  %v334_v37 = vld [vmem:[%s1712_s10 + $0x90] sm:$0xff] }
  0x21   : > { %355 = vst.msk [vmem:[#allocation2 + $0x88] sm:$0x3] %vm314_vm1, %v330_v29  ;;  %358 = vst.msk [vmem:[#allocation2 + $0xa0] sm:$0x3] %vm314_vm1, %v333_v34  ;;  %v335_v38 = vld [vmem:[%s1712_s10 + $0x98] sm:$0xff]  ;;  %v1805_v41 = vld [vmem:[#allocation2 + $0x20] sm:$0xff] }
  0x22   : > { %356 = vst.msk [vmem:[#allocation2 + $0x90] sm:$0xff] %vm311_vm0, %v331_v32  ;;  %357 = vst.msk [vmem:[#allocation2 + $0x98] sm:$0xff] %vm311_vm0, %v332_v33  ;;  %v336_v39 = vld [vmem:[%s1712_s10 + $0xa0] sm:$0x3]  ;;  %v1803_v40 = vld [vmem:[#allocation2 + $0x18] sm:$0xff]  ;;  %v531_v49 = vmul.f32 %v1771_v26, %v1805_v41  ;;  %v663_v53 = vmul.f32 %v1783_v31, %v1805_v41  ;;  %v506_v17 = vmul.f32 %v1810_v43, %v1805_v41 }
  0x23   : > { %v1807_v42 = vld [vmem:[#allocation2 + $0x30] sm:$0xff]  ;;  %359 = vst.msk [vmem:[#allocation2 + $0xa8] sm:$0xff] %vm311_vm0, %v334_v37  ;;  %360 = vst.msk [vmem:[#allocation2 + $0xb0] sm:$0xff] %vm311_vm0, %v335_v38  ;;  %v1818_v45 = vld [vmem:[#allocation2 + $0x38] sm:$0xff]  ;;  %v430_v46 = vmul.f32 %v1765_v24, %v1803_v40  ;;  %v530_v48 = vmul.f32 %v1771_v26, %v1803_v40  ;;  %v662_v52 = vmul.f32 %v1783_v31, %v1803_v40 }
  0x24   : > { %361 = vst.msk [vmem:[#allocation2 + $0xb8] sm:$0x3] %vm314_vm1, %v336_v39  ;;  %v466_v47 = vmul.f32 %v1768_v25, %v1807_v42  ;;  %v582_v50 = vmul.f32 %v1780_v30, %v1807_v42  ;;  %v583_v51 = vmul.f32 %v1780_v30, %v1818_v45  ;;  %v1836_v54 = vld [vmem:[#allocation2 + $0x48] sm:$0xff]  ;;  %v373_v55 = vld [vmem:[#allocation2] sm:$0xff]  ;;  %v714_v57 = vmul.f32 %v1795_v36, %v1807_v42  ;;  %v1864_v15 = vld [vmem:[#allocation2 + $0x50] sm:$0xff] }
  0x25   : > { %v1838_v56 = vld [vmem:[#allocation2 + $0x8] sm:$0xff]  ;;  %v715_v58 = vmul.f32 %v1795_v36, %v1818_v45  ;;  %v412_v59 = vmul.f32 %v1792_v35, %v1803_v40  ;;  %v432_v60 = vmul.f32 %v1765_v24, %v1807_v42  ;;  %v410_v61 = vmul.f32 %v1792_v35, %v373_v55  ;;  %v338_v27 = vld [vmem:[%s1712_s10 + $0xb0] sm:$0xff]  ;;  %v339_v28 = vld [vmem:[%s1712_s10 + $0xb8] sm:$0x3] }
  0x26   : > { %v502_v62 = vmul.f32 %v1810_v43, %v373_v55  ;;  %v503_v63 = vmul.f32 %v1810_v43, %v1838_v56  ;;  %v634_v0 = vmul.f32 %v1813_v44, %v373_v55  ;;  %v635_v1 = vmul.f32 %v1813_v44, %v1838_v56  ;;  %v337_v23 = vld [vmem:[%s1712_s10 + $0xa8] sm:$0xff]  ;;  %363 = vst.msk [vmem:[#allocation2 + $0xc8] sm:$0xff] %vm311_vm0, %v338_v27  ;;  %v1530_v37 = vld [vmem:[%s1741_s26 + $0x18] sm:$0xff]  ;;  %v1531_v38 = vld [vmem:[%s1741_s26 + $0x20] sm:$0xff]  ;;  %s304_s10 = sadd.s32 %s1528_s9, %s1527_s8 }
  0x27   : > { %v448_v3 = vadd.f32 %v432_v60, %v412_v59  ;;  %v468_v4 = vmul.f32 %v1768_v25, %v1836_v54  ;;  %v505_v5 = vmul.f32 %v1810_v43, %v1803_v40  ;;  %v446_v6 = vadd.f32 %v430_v46, %v410_v61  ;;  %362 = vst.msk [vmem:[#allocation2 + $0xc0] sm:$0xff] %vm311_vm0, %v337_v23  ;;  %v1532_v39 = vld [vmem:[%s1741_s26 + $0x28] sm:$0x3]  ;;  %s1529_s19 = sshll.u32 %s304_s10, 3 }
  0x28   : > { %v554_v7 = vadd.f32 %v530_v48, %v502_v62  ;;  %v555_v9 = vadd.f32 %v531_v49, %v503_v63  ;;  %v686_v12 = vadd.f32 %v662_v52, %v634_v0  ;;  %v687_v13 = vadd.f32 %v663_v53, %v635_v1  ;;  %364 = vst.msk [vmem:[#allocation2 + $0xd0] sm:$0x3] %vm314_vm1, %v339_v28  ;;  %s2512_s12 = scalar_lea.vmem %s2634_s5, %s1529_s19 }
  0x29   : > { %v484_v16 = vadd.f32 %v468_v4, %v448_v3  ;;  %v533_v18 = vmul.f32 %v1771_v26, %v1807_v42  ;;  %v482_v19 = vadd.f32 %v466_v47, %v446_v6  ;;  %v534_v32 = vmul.f32 %v1771_v26, %v1818_v45  ;;  %370 = vst.msk [vmem:[#allocation2 + $0xd8] sm:$0xff] %vm311_vm0, %v1530_v37  ;;  %v375_v4 = vld [vmem:[#allocation2 + $0x10] sm:$0x3] }
  0x2a   : > { %v606_v20 = vadd.f32 %v582_v50, %v554_v7  ;;  %v1870_v21 = vadd.f32 %v583_v51, %v555_v9  ;;  %v738_v22 = vadd.f32 %v714_v57, %v686_v12  ;;  %v1875_v29 = vadd.f32 %v715_v58, %v687_v13  ;;  %371 = vst.msk [vmem:[#allocation2 + $0xe0] sm:$0xff] %vm311_vm0, %v1531_v38 }
  0x2b   : > { %v557_v33 = vadd.f32 %v533_v18, %v505_v5  ;;  %v585_v34 = vmul.f32 %v1780_v30, %v1836_v54  ;;  %v769_v46 = vadd.f32 %v1862_v14, %v482_v19  ;;  %372 = vst.msk [vmem:[#allocation2 + $0xe8] sm:$0x3] %vm314_vm1, %v1532_v39  ;;  %v558_v51 = vadd.f32 %v534_v32, %v506_v17  ;;  %v378_v5 = vld [vmem:[#allocation2 + $0x28] sm:$0x3] }
  0x2c   : > { %v810_v47 = vrot.slane %v606_v20, 1  ;;  %v811_v48 = vrot.slane %v1870_v21, 1  ;;  %v907_v49 = vrot.slane %v738_v22, 2  ;;  %v908_v50 = vrot.slane %v1875_v29, 2  ;;  %v1931_v22 = vld [vmem:[#allocation2 + $0x40] sm:$0x3] }
  0x2d   : > { %v586_v52 = vmul.f32 %v1780_v30, %v1864_v15  ;;  %v609_v53 = vadd.f32 %v585_v34, %v557_v33  ;;  %v637_v57 = vmul.f32 %v1813_v44, %v1803_v40  ;;  %v638_v58 = vmul.f32 %v1813_v44, %v1805_v41  ;;  %v1978_v21 = vld [vmem:[#allocation2 + $0x68] sm:$0xff] }
  0x2e   : > { %v812_v55 = vsel %vm809_vm2, %v810_v47, %v811_v48  ;;  %v665_v59 = vmul.f32 %v1783_v31, %v1807_v42  ;;  %v909_v61 = vsel %vm906_vm3, %v907_v49, %v908_v50  ;;  %v666_v63 = vmul.f32 %v1783_v31, %v1818_v45  ;;  %v1942_v49 = vld [vmem:[#allocation2 + $0x58] sm:$0x3] }
  0x2f   : > { %v866_v60 = vadd.f32 %v812_v55, %v769_v46  ;;  %v1907_v62 = vadd.f32 %v586_v52, %v558_v51  ;;  %v717_v40 = vmul.f32 %v1795_v36, %v1836_v54  ;;  %v718_v1 = vmul.f32 %v1795_v36, %v1864_v15 }
  0x30   : > { %v689_v0 = vadd.f32 %v665_v59, %v637_v57  ;;  %v771_v3 = vadd.f32 %v1862_v14, %v484_v16  ;;  %v690_v7 = vadd.f32 %v666_v63, %v638_v58  ;;  %v815_v9 = vrot.slane %v609_v53, 1 }
  0x31   : > { %v1916_v6 = vadd.f32 %v909_v61, %v866_v60  ;;  %v816_v12 = vrot.slane %v1907_v62, 1  ;;  %v411_v17 = vmul.f32 %v1792_v35, %v1838_v56  ;;  %v431_v18 = vmul.f32 %v1765_v24, %v1805_v41 }
  0x32   : > { %v741_v13 = vadd.f32 %v717_v40, %v689_v0  ;;  %v467_v19 = vmul.f32 %v1768_v25, %v1818_v45  ;;  %v1926_v16 = vadd.f32 %v718_v1, %v690_v7  ;;  %v504_v23 = vmul.f32 %v1810_v43, %v375_v4 }
  0x33   : > { %982 = vperm.xlu0 %1584, %v1916_v6   ;;  %v817_v20 = vsel %vm809_vm2, %v815_v9, %v816_v12  ;;  %v532_v56 = vmul.f32 %v1771_v26, %v378_v5  ;;  %v447_v32 = vadd.f32 %v431_v18, %v411_v17  ;;  %v584_v33 = vmul.f32 %v1780_v30, %v1931_v22 }
  0x34   : > { %v868_v27 = vadd.f32 %v817_v20, %v771_v3  ;;  %v912_v28 = vrot.slane %v741_v13, 2  ;;  %v913_v34 = vrot.slane %v1926_v16, 2  ;;  %v636_v38 = vmul.f32 %v1813_v44, %v375_v4  ;;  %v1965_v13 = vld [vmem:[#allocation2 + $0x60] sm:$0xff] }
  0x35   : > { %v556_v37 = vadd.f32 %v532_v56, %v504_v23  ;;  %v664_v39 = vmul.f32 %v1783_v31, %v378_v5  ;;  %v483_v46 = vadd.f32 %v467_v19, %v447_v32  ;;  %v716_v47 = vmul.f32 %v1795_v36, %v1931_v22 }
  0x36   : > { %v413_v51 = vmul.f32 %v1792_v35, %v1805_v41  ;;  %v433_v52 = vmul.f32 %v1765_v24, %v1818_v45  ;;  %v914_v53 = vsel %vm906_vm3, %v912_v28, %v913_v34  ;;  %v469_v58 = vmul.f32 %v1768_v25, %v1864_v15 }
  0x37   : > { %v608_v55 = vadd.f32 %v584_v33, %v556_v37  ;;  %v688_v57 = vadd.f32 %v664_v39, %v636_v38  ;;  %v1951_v59 = vadd.f32 %v914_v53, %v868_v27  ;;  %v770_v60 = vadd.f32 %v1862_v14, %v483_v46 }
  0x38   : > { %v449_v61 = vadd.f32 %v433_v52, %v413_v51  ;;  %v507_v63 = vmul.f32 %v1810_v43, %v378_v5  ;;  %v535_v41 = vmul.f32 %v1771_v26, %v1931_v22  ;;  %v587_v1 = vmul.f32 %v1780_v30, %v1942_v49 }
  0x39   : > { %v740_v0 = vadd.f32 %v716_v47, %v688_v57  ;;  %v813_v40 = vrot.slane %v608_v55, 1  ;;  %992 = vperm.xlu1 %1585, %v1951_v59   ;;  %v639_v4 = vmul.f32 %v1813_v44, %v378_v5  ;;  %v667_v7 = vmul.f32 %v1783_v31, %v1931_v22 }
  0x3a   : > { %v485_v3 = vadd.f32 %v469_v58, %v449_v61  ;;  %v719_v9 = vmul.f32 %v1795_v36, %v1942_v49  ;;  %v559_v19 = vadd.f32 %v535_v41, %v507_v63  ;;  %v414_v16 = vmul.f32 %v1792_v35, %v1807_v42 }
  0x3b   : > { %v814_v17 = vsel %vm809_vm2, %v811_v48, %v813_v40  ;;  %v910_v18 = vrot.slane %v740_v0, 2  ;;  %v691_v23 = vadd.f32 %v667_v7, %v639_v4  ;;  %v434_v56 = vmul.f32 %v1765_v24, %v1836_v54 }
  0x3c   : > { %v867_v20 = vadd.f32 %v814_v17, %v770_v60  ;;  %v772_v5 = vadd.f32 %v1862_v14, %v485_v3  ;;  %v611_v28 = vadd.f32 %v587_v1, %v559_v19  ;;  %v470_v48 = vmul.f32 %v1768_v25, %v1965_v13 }
  0x3d   : > { %v911_v27 = vsel %vm906_vm3, %v908_v50, %v910_v18  ;;  %v508_v32 = vmul.f32 %v1810_v43, %v1807_v42  ;;  %v743_v37 = vadd.f32 %v719_v9, %v691_v23  ;;  %v450_v38 = vadd.f32 %v434_v56, %v414_v16  ;;  %v2016_v9 = vld [vmem:[#allocation2 + $0x70] sm:$0x3] }
  0x3e   : > { %v1984_v33 = vadd.f32 %v911_v27, %v867_v20  ;;  %v509_v39 = vmul.f32 %v1810_v43, %v1818_v45  ;;  %v818_v46 = vrot.slane %v611_v28, 1  ;;  %v536_v29 = vmul.f32 %v1771_v26, %v1836_v54 }
  0x3f   : > { %v537_v50 = vmul.f32 %v1771_v26, %v1864_v15  ;;  %v588_v47 = vmul.f32 %v1780_v30, %v1965_v13  ;;  %v915_v51 = vrot.slane %v743_v37, 2  ;;  %v486_v52 = vadd.f32 %v470_v48, %v450_v38 }
  0x40   : > { %987 = vperm.xlu0 %1584, %v1984_v33   ;;  %v589_v53 = vmul.f32 %v1780_v30, %v1978_v21  ;;  %v640_v55 = vmul.f32 %v1813_v44, %v1807_v42  ;;  %v819_v57 = vsel %vm809_vm2, %v816_v12, %v818_v46  ;;  %v560_v58 = vadd.f32 %v536_v29, %v508_v32  ;;  %v2032_v32 = vld [vmem:[#allocation2 + $0x78] sm:$0xff] }
  0x41   : > { %v561_v60 = vadd.f32 %v537_v50, %v509_v39  ;;  %v641_v61 = vmul.f32 %v1813_v44, %v1818_v45  ;;  %v869_v63 = vadd.f32 %v819_v57, %v772_v5  ;;  %v916_v0 = vsel %vm906_vm3, %v913_v34, %v915_v51 }
  0x42   : > { %v668_v40 = vmul.f32 %v1783_v31, %v1836_v54  ;;  %v669_v41 = vmul.f32 %v1783_v31, %v1864_v15  ;;  %v612_v1 = vadd.f32 %v588_v47, %v560_v58  ;;  %v720_v62 = vmul.f32 %v1795_v36, %v1965_v13 }
  0x43   : > { %v613_v42 = vadd.f32 %v589_v53, %v561_v60  ;;  %v721_v12 = vmul.f32 %v1795_v36, %v1978_v21  ;;  %v2013_v3 = vadd.f32 %v916_v0, %v869_v63  ;;  %v773_v34 = vadd.f32 %v1862_v14, %v486_v52  ;;  %v2050_v63 = vld [vmem:[#allocation2 + $0x80] sm:$0xff] }
  0x44   : > { %v692_v4 = vadd.f32 %v668_v40, %v640_v55  ;;  %v693_v7 = vadd.f32 %v669_v41, %v641_v61  ;;  %v820_v17 = vrot.slane %v612_v1, 1  ;;  %v415_v19 = vmul.f32 %v1792_v35, %v1818_v45 }
  0x45   : > { %v821_v18 = vrot.slane %v613_v42, 1  ;;  %v435_v16 = vmul.f32 %v1765_v24, %v1864_v15  ;;  %997 = vperm.xlu1 %1585, %v2013_v3   ;;  %v471_v5 = vmul.f32 %v1768_v25, %v1978_v21  ;;  %v510_v56 = vmul.f32 %v1810_v43, %v1931_v22 }
  0x46   : > { %v744_v20 = vadd.f32 %v720_v62, %v692_v4  ;;  %v745_v23 = vadd.f32 %v721_v12, %v693_v7  ;;  %v538_v48 = vmul.f32 %v1771_v26, %v1942_v49  ;;  %v590_v45 = vmul.f32 %v1780_v30, %v2016_v9 }
  0x47   : > { %v822_v27 = vsel %vm809_vm2, %v820_v17, %v821_v18  ;;  %v451_v28 = vadd.f32 %v435_v16, %v415_v19  ;;  %v642_v46 = vmul.f32 %v1813_v44, %v1931_v22  ;;  %v670_v47 = vmul.f32 %v1783_v31, %v1942_v49 }
  0x48   : > { %v870_v37 = vadd.f32 %v822_v27, %v773_v34  ;;  %v917_v38 = vrot.slane %v744_v20, 2  ;;  %v918_v39 = vrot.slane %v745_v23, 2  ;;  %v562_v50 = vadd.f32 %v538_v48, %v510_v56 }
  0x49   : > { %v487_v29 = vadd.f32 %v471_v5, %v451_v28  ;;  %v722_v51 = vmul.f32 %v1795_v36, %v2016_v9  ;;  %v416_v53 = vmul.f32 %v1792_v35, %v1836_v54  ;;  %v436_v55 = vmul.f32 %v1765_v24, %v1965_v13 }
  0x4a   : > { %v919_v52 = vsel %vm906_vm3, %v917_v38, %v918_v39  ;;  %v472_v57 = vmul.f32 %v1768_v25, %v2032_v32  ;;  %v614_v58 = vadd.f32 %v590_v45, %v562_v50  ;;  %v694_v60 = vadd.f32 %v670_v47, %v642_v46  ;;  %v2082_v47 = vld [vmem:[#allocation2 + $0x88] sm:$0x3] }
  0x4b   : > { %v2047_v22 = vadd.f32 %v919_v52, %v870_v37  ;;  %v774_v61 = vadd.f32 %v1862_v14, %v487_v29  ;;  %v452_v0 = vadd.f32 %v436_v55, %v416_v53  ;;  %v511_v40 = vmul.f32 %v1810_v43, %v1836_v54 }
  0x4c   : > { %v512_v41 = vmul.f32 %v1810_v43, %v1864_v15  ;;  %v539_v1 = vmul.f32 %v1771_v26, %v1965_v13  ;;  %v746_v42 = vadd.f32 %v722_v51, %v694_v60  ;;  %v823_v62 = vrot.slane %v614_v58, 1 }
  0x4d   : > { %1002 = vperm.xlu0 %1584, %v2047_v22   ;;  %v540_v12 = vmul.f32 %v1771_v26, %v1978_v21  ;;  %v591_v4 = vmul.f32 %v1780_v30, %v2032_v32  ;;  %v488_v7 = vadd.f32 %v472_v57, %v452_v0  ;;  %v592_v17 = vmul.f32 %v1780_v30, %v2050_v63 }
  0x4e   : > { %v563_v34 = vadd.f32 %v539_v1, %v511_v40  ;;  %v643_v19 = vmul.f32 %v1813_v44, %v1836_v54  ;;  %v824_v16 = vsel %vm809_vm2, %v821_v18, %v823_v62  ;;  %v920_v20 = vrot.slane %v746_v42, 2 }
  0x4f   : > { %v564_v23 = vadd.f32 %v540_v12, %v512_v41  ;;  %v644_v5 = vmul.f32 %v1813_v44, %v1864_v15  ;;  %v871_v56 = vadd.f32 %v824_v16, %v774_v61  ;;  %v671_v28 = vmul.f32 %v1783_v31, %v1965_v13  ;;  %v2098_v41 = vld [vmem:[#allocation2 + $0x90] sm:$0xff] }
  0x50   : > { %v615_v27 = vadd.f32 %v591_v4, %v563_v34  ;;  %v672_v48 = vmul.f32 %v1783_v31, %v1978_v21  ;;  %v921_v45 = vsel %vm906_vm3, %v918_v39, %v920_v20  ;;  %v723_v54 = vmul.f32 %v1795_v36, %v2032_v32 }
  0x51   : > { %v616_v37 = vadd.f32 %v592_v17, %v564_v23  ;;  %v724_v18 = vmul.f32 %v1795_v36, %v2050_v63  ;;  %v2079_v38 = vadd.f32 %v921_v45, %v871_v56  ;;  %v695_v46 = vadd.f32 %v671_v28, %v643_v19  ;;  %v2116_v28 = vld [vmem:[#allocation2 + $0x98] sm:$0xff] }
  0x52   : > { %v696_v29 = vadd.f32 %v672_v48, %v644_v5  ;;  %v775_v50 = vadd.f32 %v1862_v14, %v488_v7  ;;  %v825_v51 = vrot.slane %v615_v27, 1  ;;  %v417_v39 = vmul.f32 %v1792_v35, %v1864_v15 }
  0x53   : > { %v826_v52 = vrot.slane %v616_v37, 1  ;;  %v437_v53 = vmul.f32 %v1765_v24, %v1978_v21  ;;  %1007 = vperm.xlu1 %1585, %v2079_v38   ;;  %v747_v55 = vadd.f32 %v723_v54, %v695_v46  ;;  %v473_v58 = vmul.f32 %v1768_v25, %v2050_v63 }
  0x54   : > { %v748_v57 = vadd.f32 %v724_v18, %v696_v29  ;;  %v513_v60 = vmul.f32 %v1810_v43, %v1942_v49  ;;  %v541_v40 = vmul.f32 %v1771_v26, %v2016_v9  ;;  %v593_v15 = vmul.f32 %v1780_v30, %v2082_v47 }
  0x55   : > { %v827_v61 = vsel %vm809_vm2, %v825_v51, %v826_v52  ;;  %v453_v0 = vadd.f32 %v437_v53, %v417_v39  ;;  %v922_v42 = vrot.slane %v747_v55, 2  ;;  %v645_v12 = vmul.f32 %v1813_v44, %v1942_v49 }
  0x56   : > { %v872_v1 = vadd.f32 %v827_v61, %v775_v50  ;;  %v923_v62 = vrot.slane %v748_v57, 2  ;;  %v565_v7 = vadd.f32 %v541_v40, %v513_v60  ;;  %v673_v34 = vmul.f32 %v1783_v31, %v2016_v9 }
  0x57   : > { %v489_v4 = vadd.f32 %v473_v58, %v453_v0  ;;  %v725_v17 = vmul.f32 %v1795_v36, %v2082_v47  ;;  %v418_v16 = vmul.f32 %v1792_v35, %v1965_v13  ;;  %v438_v20 = vmul.f32 %v1765_v24, %v2032_v32 }
  0x58   : > { %v924_v19 = vsel %vm906_vm3, %v922_v42, %v923_v62  ;;  %v474_v23 = vmul.f32 %v1768_v25, %v2098_v41  ;;  %v617_v5 = vadd.f32 %v593_v15, %v565_v7  ;;  %v697_v56 = vadd.f32 %v673_v34, %v645_v12 }
  0x59   : > { %v2113_v49 = vadd.f32 %v924_v19, %v872_v1  ;;  %v776_v27 = vadd.f32 %v1862_v14, %v489_v4  ;;  %v454_v48 = vadd.f32 %v438_v20, %v418_v16  ;;  %v514_v45 = vmul.f32 %v1810_v43, %v1965_v13  ;;  %v2148_v19 = vld [vmem:[#allocation2 + $0xa0] sm:$0x3] }
  0x5a   : > { %v515_v37 = vmul.f32 %v1810_v43, %v1978_v21  ;;  %v542_v54 = vmul.f32 %v1771_v26, %v2032_v32  ;;  %v749_v18 = vadd.f32 %v725_v17, %v697_v56  ;;  %v828_v46 = vrot.slane %v617_v5, 1 }
  0x5b   : > { %1012 = vperm.xlu0 %1584, %v2113_v49   ;;  %v543_v29 = vmul.f32 %v1771_v26, %v2050_v63  ;;  %v594_v50 = vmul.f32 %v1780_v30, %v2098_v41  ;;  %v490_v51 = vadd.f32 %v474_v23, %v454_v48  ;;  %v595_v53 = vmul.f32 %v1780_v30, %v2116_v28 }
  0x5c   : > { %v566_v39 = vadd.f32 %v542_v54, %v514_v45  ;;  %v646_v55 = vmul.f32 %v1813_v44, %v1965_v13  ;;  %v829_v57 = vsel %vm809_vm2, %v826_v52, %v828_v46  ;;  %v925_v58 = vrot.slane %v749_v18, 2  ;;  %v2164_v18 = vld [vmem:[#allocation2 + $0xa8] sm:$0xff] }
  0x5d   : > { %v567_v60 = vadd.f32 %v543_v29, %v515_v37  ;;  %v647_v61 = vmul.f32 %v1813_v44, %v1978_v21  ;;  %v873_v0 = vadd.f32 %v829_v57, %v776_v27  ;;  %v674_v15 = vmul.f32 %v1783_v31, %v2032_v32 }
  0x5e   : > { %v618_v40 = vadd.f32 %v594_v50, %v566_v39  ;;  %v675_v1 = vmul.f32 %v1783_v31, %v2050_v63  ;;  %v926_v42 = vsel %vm906_vm3, %v923_v62, %v925_v58  ;;  %v726_v13 = vmul.f32 %v1795_v36, %v2098_v41 }
  0x5f   : > { %v619_v12 = vadd.f32 %v595_v53, %v567_v60  ;;  %v727_v52 = vmul.f32 %v1795_v36, %v2116_v28  ;;  %v2145_v4 = vadd.f32 %v926_v42, %v873_v0  ;;  %v698_v7 = vadd.f32 %v674_v15, %v646_v55  ;;  %v2182_v42 = vld [vmem:[#allocation2 + $0xb0] sm:$0xff] }
  0x60   : > { %v699_v34 = vadd.f32 %v675_v1, %v647_v61  ;;  %v777_v17 = vadd.f32 %v1862_v14, %v490_v51  ;;  %v830_v16 = vrot.slane %v618_v40, 1  ;;  %v419_v62 = vmul.f32 %v1792_v35, %v1978_v21 }
  0x61   : > { %v831_v20 = vrot.slane %v619_v12, 1  ;;  %v439_v23 = vmul.f32 %v1765_v24, %v2050_v63  ;;  %1017 = vperm.xlu1 %1585, %v2145_v4   ;;  %v750_v5 = vadd.f32 %v726_v13, %v698_v7  ;;  %v475_v27 = vmul.f32 %v1768_v25, %v2116_v28 }
  0x62   : > { %v751_v56 = vadd.f32 %v727_v52, %v699_v34  ;;  %v516_v48 = vmul.f32 %v1810_v43, %v2016_v9  ;;  %v544_v54 = vmul.f32 %v1771_v26, %v2082_v47  ;;  %v596_v21 = vmul.f32 %v1780_v30, %v2148_v19 }
  0x63   : > { %v832_v45 = vsel %vm809_vm2, %v830_v16, %v831_v20  ;;  %v455_v37 = vadd.f32 %v439_v23, %v419_v62  ;;  %v927_v29 = vrot.slane %v750_v5, 2  ;;  %v648_v51 = vmul.f32 %v1813_v44, %v2016_v9 }
  0x64   : > { %v874_v46 = vadd.f32 %v832_v45, %v777_v17  ;;  %v928_v50 = vrot.slane %v751_v56, 2  ;;  %v568_v53 = vadd.f32 %v544_v54, %v516_v48  ;;  %v676_v55 = vmul.f32 %v1783_v31, %v2082_v47 }
  0x65   : > { %v491_v39 = vadd.f32 %v475_v27, %v455_v37  ;;  %v728_v57 = vmul.f32 %v1795_v36, %v2148_v19  ;;  %v420_v60 = vmul.f32 %v1792_v35, %v2032_v32  ;;  %v440_v61 = vmul.f32 %v1765_v24, %v2098_v41 }
  0x66   : > { %v929_v58 = vsel %vm906_vm3, %v927_v29, %v928_v50  ;;  %v476_v0 = vmul.f32 %v1768_v25, %v2164_v18  ;;  %v620_v40 = vadd.f32 %v596_v21, %v568_v53  ;;  %v700_v15 = vadd.f32 %v676_v55, %v648_v51 }
  0x67   : > { %v2179_v9 = vadd.f32 %v929_v58, %v874_v46  ;;  %v778_v1 = vadd.f32 %v1862_v14, %v491_v39  ;;  %v456_v12 = vadd.f32 %v440_v61, %v420_v60  ;;  %v517_v13 = vmul.f32 %v1810_v43, %v2032_v32  ;;  %v2214_v61 = vld [vmem:[#allocation2 + $0xb8] sm:$0x3] }
  0x68   : > { %v518_v52 = vmul.f32 %v1810_v43, %v2050_v63  ;;  %v545_v7 = vmul.f32 %v1771_v26, %v2098_v41  ;;  %v752_v34 = vadd.f32 %v728_v57, %v700_v15  ;;  %v833_v17 = vrot.slane %v620_v40, 1 }
  0x69   : > { %1022 = vperm.xlu0 %1584, %v2179_v9   ;;  %v546_v16 = vmul.f32 %v1771_v26, %v2116_v28  ;;  %v597_v62 = vmul.f32 %v1780_v30, %v2164_v18  ;;  %v492_v23 = vadd.f32 %v476_v0, %v456_v12  ;;  %v598_v56 = vmul.f32 %v1780_v30, %v2182_v42 }
  0x6a   : > { %v569_v5 = vadd.f32 %v545_v7, %v517_v13  ;;  %v649_v27 = vmul.f32 %v1813_v44, %v2032_v32  ;;  %v834_v48 = vsel %vm809_vm2, %v831_v20, %v833_v17  ;;  %v930_v45 = vrot.slane %v752_v34, 2 }
  0x6b   : > { %v570_v37 = vadd.f32 %v546_v16, %v518_v52  ;;  %v650_v54 = vmul.f32 %v1813_v44, %v2050_v63  ;;  %v875_v21 = vadd.f32 %v834_v48, %v778_v1  ;;  %v677_v29 = vmul.f32 %v1783_v31, %v2098_v41  ;;  %v2230_v16 = vld [vmem:[#allocation2 + $0xc0] sm:$0xff] }
  0x6c   : > { %v621_v46 = vadd.f32 %v597_v62, %v569_v5  ;;  %v678_v51 = vmul.f32 %v1783_v31, %v2116_v28  ;;  %v931_v39 = vsel %vm906_vm3, %v928_v50, %v930_v45  ;;  %v729_v32 = vmul.f32 %v1795_v36, %v2164_v18 }
  0x6d   : > { %v622_v53 = vadd.f32 %v598_v56, %v570_v37  ;;  %v730_v20 = vmul.f32 %v1795_v36, %v2182_v42  ;;  %v2211_v55 = vadd.f32 %v931_v39, %v875_v21  ;;  %v701_v57 = vadd.f32 %v677_v29, %v649_v27 }
  0x6e   : > { %v702_v58 = vadd.f32 %v678_v51, %v650_v54  ;;  %v779_v60 = vadd.f32 %v1862_v14, %v492_v23  ;;  %v835_v0 = vrot.slane %v621_v46, 1  ;;  %v421_v50 = vmul.f32 %v1792_v35, %v2050_v63 }
  0x6f   : > { %v836_v40 = vrot.slane %v622_v53, 1  ;;  %v441_v15 = vmul.f32 %v1765_v24, %v2116_v28  ;;  %1027 = vperm.xlu1 %1585, %v2211_v55   ;;  %v753_v1 = vadd.f32 %v729_v32, %v701_v57  ;;  %v477_v13 = vmul.f32 %v1768_v25, %v2182_v42  ;;  %v2248_v32 = vld [vmem:[#allocation2 + $0xc8] sm:$0xff] }
  0x70   : > { %v754_v12 = vadd.f32 %v730_v20, %v702_v58  ;;  %v519_v52 = vmul.f32 %v1810_v43, %v2082_v47  ;;  %v547_v17 = vmul.f32 %v1771_v26, %v2148_v19  ;;  %v599_v63 = vmul.f32 %v1780_v30, %v2214_v61 }
  0x71   : > { %v837_v7 = vsel %vm809_vm2, %v835_v0, %v836_v40  ;;  %v457_v34 = vadd.f32 %v441_v15, %v421_v50  ;;  %v932_v23 = vrot.slane %v753_v1, 2  ;;  %v651_v56 = vmul.f32 %v1813_v44, %v2082_v47 }
  0x72   : > { %v876_v62 = vadd.f32 %v837_v7, %v779_v60  ;;  %v933_v5 = vrot.slane %v754_v12, 2  ;;  %v571_v48 = vadd.f32 %v547_v17, %v519_v52  ;;  %v679_v45 = vmul.f32 %v1783_v31, %v2148_v19 }
  0x73   : > { %v493_v27 = vadd.f32 %v477_v13, %v457_v34  ;;  %v731_v37 = vmul.f32 %v1795_v36, %v2214_v61  ;;  %v422_v21 = vmul.f32 %v1792_v35, %v2098_v41  ;;  %v442_v46 = vmul.f32 %v1765_v24, %v2164_v18 }
  0x74   : > { %v934_v54 = vsel %vm906_vm3, %v932_v23, %v933_v5  ;;  %v478_v29 = vmul.f32 %v1768_v25, %v2230_v16  ;;  %v623_v51 = vadd.f32 %v599_v63, %v571_v48  ;;  %v703_v39 = vadd.f32 %v679_v45, %v651_v56 }
  0x75   : > { %v2245_v47 = vadd.f32 %v934_v54, %v876_v62  ;;  %v780_v53 = vadd.f32 %v1862_v14, %v493_v27  ;;  %v458_v20 = vadd.f32 %v442_v46, %v422_v21  ;;  %v520_v57 = vmul.f32 %v1810_v43, %v2098_v41 }
  0x76   : > { %v521_v58 = vmul.f32 %v1810_v43, %v2116_v28  ;;  %v548_v60 = vmul.f32 %v1771_v26, %v2164_v18  ;;  %v755_v0 = vadd.f32 %v731_v37, %v703_v39  ;;  %v838_v50 = vrot.slane %v623_v51, 1  ;;  %v2280_v51 = vld [vmem:[#allocation2 + $0xd0] sm:$0x3] }
  0x77   : > { %1032 = vperm.xlu0 %1584, %v2245_v47   ;;  %v549_v15 = vmul.f32 %v1771_v26, %v2182_v42  ;;  %v600_v1 = vmul.f32 %v1780_v30, %v2230_v16  ;;  %v494_v12 = vadd.f32 %v478_v29, %v458_v20  ;;  %v601_v52 = vmul.f32 %v1780_v30, %v2248_v32 }
  0x78   : > { %v572_v13 = vadd.f32 %v548_v60, %v520_v57  ;;  %v652_v7 = vmul.f32 %v1813_v44, %v2098_v41  ;;  %v839_v34 = vsel %vm809_vm2, %v836_v40, %v838_v50  ;;  %v935_v17 = vrot.slane %v755_v0, 2 }
  0x79   : > { %v573_v63 = vadd.f32 %v549_v15, %v521_v58  ;;  %v653_v62 = vmul.f32 %v1813_v44, %v2116_v28  ;;  %v877_v23 = vadd.f32 %v839_v34, %v780_v53  ;;  %v680_v27 = vmul.f32 %v1783_v31, %v2164_v18 }
  0x7a   : > { %v624_v56 = vadd.f32 %v600_v1, %v572_v13  ;;  %v681_v48 = vmul.f32 %v1783_v31, %v2182_v42  ;;  %v936_v45 = vsel %vm906_vm3, %v933_v5, %v935_v17  ;;  %v732_v41 = vmul.f32 %v1795_v36, %v2230_v16 }
  0x7b   : > { %v625_v37 = vadd.f32 %v601_v52, %v573_v63  ;;  %v733_v40 = vmul.f32 %v1795_v36, %v2248_v32  ;;  %v2277_v54 = vadd.f32 %v936_v45, %v877_v23  ;;  %v704_v21 = vadd.f32 %v680_v27, %v652_v7 }
  0x7c   : > { %v705_v46 = vadd.f32 %v681_v48, %v653_v62  ;;  %v781_v29 = vadd.f32 %v1862_v14, %v494_v12  ;;  %v840_v39 = vrot.slane %v624_v56, 1  ;;  %v423_v5 = vmul.f32 %v1792_v35, %v2116_v28  ;;  %v400_v12 = vld [vmem:[#allocation2 + $0xd8] sm:$0xff] }
  0x7d   : > { %v841_v53 = vrot.slane %v625_v37, 1  ;;  %v443_v20 = vmul.f32 %v1765_v24, %v2182_v42  ;;  %1037 = vperm.xlu1 %1585, %v2277_v54   ;;  %v756_v57 = vadd.f32 %v732_v41, %v704_v21  ;;  %v479_v60 = vmul.f32 %v1768_v25, %v2248_v32  ;;  %v401_v21 = vld [vmem:[#allocation2 + $0xe0] sm:$0xff] }
  0x7e   : > { %v757_v58 = vadd.f32 %v733_v40, %v705_v46  ;;  %v522_v0 = vmul.f32 %v1810_v43, %v2148_v19  ;;  %v550_v1 = vmul.f32 %v1771_v26, %v2214_v61  ;;  %v602_v28 = vmul.f32 %v1780_v30, %v2280_v51 }
  0x7f   : > { %v842_v50 = vsel %vm809_vm2, %v840_v39, %v841_v53  ;;  %v459_v15 = vadd.f32 %v443_v20, %v423_v5  ;;  %v937_v52 = vrot.slane %v756_v57, 2  ;;  %v654_v34 = vmul.f32 %v1813_v44, %v2148_v19 }
  0x80   : > { %v878_v13 = vadd.f32 %v842_v50, %v781_v29  ;;  %v938_v7 = vrot.slane %v757_v58, 2  ;;  %v574_v63 = vadd.f32 %v550_v1, %v522_v0  ;;  %v682_v62 = vmul.f32 %v1783_v31, %v2214_v61 }
  0x81   : > { %v495_v17 = vadd.f32 %v479_v60, %v459_v15  ;;  %v734_v23 = vmul.f32 %v1795_v36, %v2280_v51  ;;  %v424_v27 = vmul.f32 %v1792_v35, %v2164_v18  ;;  %v444_v48 = vmul.f32 %v1765_v24, %v2230_v16 }
  0x82   : > { %v939_v56 = vsel %vm906_vm3, %v937_v52, %v938_v7  ;;  %v480_v45 = vmul.f32 %v1768_v25, %v400_v12  ;;  %v626_v19 = vadd.f32 %v602_v28, %v574_v63  ;;  %v706_v41 = vadd.f32 %v682_v62, %v654_v34 }
  0x83   : > { %v2308_v37 = vadd.f32 %v939_v56, %v878_v13  ;;  %v782_v40 = vadd.f32 %v1862_v14, %v495_v17  ;;  %v460_v46 = vadd.f32 %v444_v48, %v424_v27  ;;  %v523_v29 = vmul.f32 %v1810_v43, %v2164_v18 }
  0x84   : > { %v524_v39 = vmul.f32 %v1810_v43, %v2182_v42  ;;  %v551_v5 = vmul.f32 %v1771_v26, %v2230_v16  ;;  %v758_v20 = vadd.f32 %v734_v23, %v706_v41  ;;  %v843_v57 = vrot.slane %v626_v19, 1 }
  0x85   : > { %1042 = vperm.xlu0 %1584, %v2308_v37   ;;  %v552_v58 = vmul.f32 %v1771_v26, %v2248_v32  ;;  %v603_v60 = vmul.f32 %v1780_v30, %v400_v12  ;;  %v496_v0 = vadd.f32 %v480_v45, %v460_v46  ;;  %v604_v15 = vmul.f32 %v1780_v30, %v401_v21 }
  0x86   : > { %v575_v50 = vadd.f32 %v551_v5, %v523_v29  ;;  %v655_v1 = vmul.f32 %v1813_v44, %v2164_v18  ;;  %v844_v28 = vsel %vm809_vm2, %v841_v53, %v843_v57  ;;  %v940_v13 = vrot.slane %v758_v20, 2 }
  0x87   : > { %v576_v52 = vadd.f32 %v552_v58, %v524_v39  ;;  %v656_v34 = vmul.f32 %v1813_v44, %v2182_v42  ;;  %v879_v17 = vadd.f32 %v844_v28, %v782_v40  ;;  %v683_v62 = vmul.f32 %v1783_v31, %v2230_v16  ;;  %v402_v40 = vld [vmem:[#allocation2 + $0xe8] sm:$0x3] }
  0x88   : > { %v627_v63 = vadd.f32 %v603_v60, %v575_v50  ;;  %v684_v23 = vmul.f32 %v1783_v31, %v2248_v32  ;;  %v941_v56 = vsel %vm906_vm3, %v938_v7, %v940_v13  ;;  %v735_v18 = vmul.f32 %v1795_v36, %v400_v12 }
  0x89   : > { %v628_v27 = vadd.f32 %v604_v15, %v576_v52  ;;  %v736_v53 = vmul.f32 %v1795_v36, %v401_v21  ;;  %v2334_v48 = vadd.f32 %v941_v56, %v879_v17  ;;  %v707_v45 = vadd.f32 %v683_v62, %v655_v1 }
  0x8a   : > { %v708_v19 = vadd.f32 %v684_v23, %v656_v34  ;;  %v783_v41 = vadd.f32 %v1862_v14, %v496_v0  ;;  %v845_v46 = vrot.slane %v627_v63, 1  ;;  %v425_v16 = vmul.f32 %v1792_v35, %v2182_v42 }
  0x8b   : > { %v846_v29 = vrot.slane %v628_v27, 1  ;;  %v445_v7 = vmul.f32 %v1765_v24, %v2248_v32  ;;  %1047 = vperm.xlu1 %1585, %v2334_v48   ;;  %v759_v12 = vadd.f32 %v735_v18, %v707_v45  ;;  %v481_v5 = vmul.f32 %v1768_v25, %v401_v21 }
  0x8c   : > { %v760_v39 = vadd.f32 %v736_v53, %v708_v19  ;;  %v525_v20 = vmul.f32 %v1810_v43, %v2214_v61  ;;  %v553_v60 = vmul.f32 %v1771_v26, %v2280_v51  ;;  %v605_v35 = vmul.f32 %v1780_v30, %v402_v40 }
  0x8d   : > { %v847_v57 = vsel %vm809_vm2, %v845_v46, %v846_v29  ;;  %v461_v58 = vadd.f32 %v445_v7, %v425_v16  ;;  %v942_v0 = vrot.slane %v759_v12, 2  ;;  %v657_v32 = vmul.f32 %v1813_v44, %v2214_v61 }
  0x8e   : > { %v880_v42 = vadd.f32 %v847_v57, %v783_v41  ;;  %v943_v24 = vrot.slane %v760_v39, 2  ;;  %v577_v15 = vadd.f32 %v553_v60, %v525_v20  ;;  %v685_v25 = vmul.f32 %v1783_v31, %v2280_v51 }
  0x8f   : > { %v497_v50 = vadd.f32 %v481_v5, %v461_v58  ;;  %v737_v43 = vmul.f32 %v1795_v36, %v402_v40  ;;  %v1633_v51 = vmov 1   ;;  %v1635_v17 = vmov 3  }
  0x90   : > { %v944_v21 = vsel %vm906_vm3, %v942_v0, %v943_v24  ;;  %v629_v26 = vadd.f32 %v605_v35, %v577_v15  ;;  %v709_v28 = vadd.f32 %v685_v25, %v657_v32 }
  0x91   : > { %v2355_v1 = vadd.f32 %v944_v21, %v880_v42  ;;  %v784_v30 = vadd.f32 %v1862_v14, %v497_v50  ;;  %v1634_v14 = vmov 2  }
  0x92   : > { %v761_v13 = vadd.f32 %v737_v43, %v709_v28  ;;  %v848_v52 = vrot.slane %v629_v26, 1 }
  0x93   : > { %1052 = vperm.xlu0 %1584, %v2355_v1  }
  0x94   : > { %v849_v44 = vsel %vm809_vm2, %v846_v29, %v848_v52  ;;  %v945_v61 = vrot.slane %v761_v13, 2 }
  0x95   : > { %v881_v34 = vadd.f32 %v849_v44, %v784_v30 }
  0x96   : > { %v946_v31 = vsel %vm906_vm3, %v943_v24, %v945_v61 }
  0x97   : > { %1586 = vset.pattern.permute.xlu0 %v1633_v51  ;;  %v978_v36 = vadd.f32 %v946_v31, %v881_v34 }
  0x98   : > { %1081 = vperm.xlu0 %1586, %v1916_v6  }
  0x99   : > { %1057 = vperm.xlu1 %1585, %v978_v36  }
  0x9c   : > { %1093 = vperm.xlu0 %1586, %v2013_v3  }
  0x9d   : > { %1587 = vset.pattern.permute.xlu1 %v1633_v51 }
  0x9e   : > { %1085 = vperm.xlu1 %1587, %v1984_v33  }
  0xa0   : > { %1101 = vperm.xlu0 %1586, %v2079_v38  }
  0xa2   : > { %1089 = vperm.xlu1 %1587, %v1951_v59  }
  0xa4   : > { %1109 = vperm.xlu0 %1586, %v2145_v4  }
  0xa6   : > { %1097 = vperm.xlu1 %1587, %v2047_v22  }
  0xa8   : > { %1117 = vperm.xlu0 %1586, %v2211_v55  }
  0xaa   : > { %1105 = vperm.xlu1 %1587, %v2113_v49  }
  0xac   : > { %1125 = vperm.xlu0 %1586, %v2277_v54  }
  0xae   : > { %1113 = vperm.xlu1 %1587, %v2179_v9  }
  0xb0   : > { %1133 = vperm.xlu0 %1586, %v2334_v48  }
  0xb2   : > { %1121 = vperm.xlu1 %1587, %v2245_v47   ;;  %v2397_v63 = vpop.permute.xlu0 %982 }
  0xb4   : > { %1141 = vperm.xlu0 %1586, %v978_v36  }
  0xb6   : > { %1129 = vperm.xlu1 %1587, %v2308_v37  }
  0xb8   : > { %1589 = vset.pattern.permute.xlu0 %v1634_v14 }
  0xb9   : > { %1185 = vperm.xlu0 %1589, %v1984_v33  }
  0xba   : > { %1137 = vperm.xlu1 %1587, %v2355_v1  }
  0xbd   : > { %1197 = vperm.xlu0 %1589, %v2047_v22  }
  0xbe   : > { %1588 = vset.pattern.permute.xlu1 %v1634_v14 }
  0xbf   : > { %1181 = vperm.xlu1 %1588, %v1916_v6  }
  0xc1   : > { %1205 = vperm.xlu0 %1589, %v2113_v49  }
  0xc3   : > { %1189 = vperm.xlu1 %1588, %v1951_v59  }
  0xc5   : > { %1213 = vperm.xlu0 %1589, %v2179_v9  }
  0xc7   : > { %1193 = vperm.xlu1 %1588, %v2013_v3  }
  0xc9   : > { %1221 = vperm.xlu0 %1589, %v2245_v47  }
  0xcb   : > { %1201 = vperm.xlu1 %1588, %v2079_v38  }
  0xcd   : > { %1229 = vperm.xlu0 %1589, %v2308_v37  }
  0xcf   : > { %1209 = vperm.xlu1 %1588, %v2145_v4  }
  0xd1   : > { %1237 = vperm.xlu0 %1589, %v2355_v1  }
  0xd3   : > { %1217 = vperm.xlu1 %1588, %v2211_v55  }
  0xd5   : > { %1590 = vset.pattern.permute.xlu0 %v1635_v17 }
  0xd6   : > { %1281 = vperm.xlu0 %1590, %v1916_v6   ;;  %v988_v6 = vpop.permute.xlu0 %987 }
  0xd7   : > { %1225 = vperm.xlu1 %1588, %v2277_v54  }
  0xda   : > { %1293 = vperm.xlu0 %1590, %v2013_v3   ;;  %v993_v3 = vpop.permute.xlu1 %992 }
  0xdb   : > { %1233 = vperm.xlu1 %1588, %v2334_v48  }
  0xde   : > { %1301 = vperm.xlu0 %1590, %v2079_v38   ;;  %v1003_v38 = vpop.permute.xlu0 %1002 }
  0xdf   : > { %1241 = vperm.xlu1 %1588, %v978_v36  }
  0xe2   : > { %1309 = vperm.xlu0 %1590, %v2145_v4   ;;  %v1013_v4 = vpop.permute.xlu0 %1012 }
  0xe3   : > { %1591 = vset.pattern.permute.xlu1 %v1635_v17 }
  0xe4   : > { %1285 = vperm.xlu1 %1591, %v1984_v33   ;;  %v2405_v33 = vpop.permute.xlu1 %997 }
  0xe6   : > { %1317 = vperm.xlu0 %1590, %v2211_v55  }
  0xe8   : > { %1289 = vperm.xlu1 %1591, %v1951_v59   ;;  %v2408_v59 = vpop.permute.xlu1 %1007 }
  0xea   : > { %1325 = vperm.xlu0 %1590, %v2277_v54  }
  0xec   : > { %1297 = vperm.xlu1 %1591, %v2047_v22   ;;  %v1023_v22 = vpop.permute.xlu0 %1022  ;;  %v2412_v55 = vpop.permute.xlu1 %1017 }
  0xee   : > { %1333 = vperm.xlu0 %1590, %v2334_v48  }
  0xf0   : > { %1305 = vperm.xlu1 %1591, %v2113_v49   ;;  %v2414_v49 = vpop.permute.xlu1 %1027 }
  0xf2   : > { %1341 = vperm.xlu0 %1590, %v978_v36  }
  0xf4   : > { %1313 = vperm.xlu1 %1591, %v2179_v9  }
  0xf6   : > { %v1033_v54 = vpop.permute.xlu0 %1032 }
  0xf8   : > { %1321 = vperm.xlu1 %1591, %v2245_v47  }
  0xfc   : > { %1329 = vperm.xlu1 %1591, %v2308_v37   ;;  %v2416_v23 = vpop.permute.xlu1 %1037  ;;  %v979_v37 = vld [vmem:[%s2633_s4] sm:$0xf] }
  0xfd   : > { %v2426_v18 = vrot.slane %v979_v37, %v1731_v10  ;;  %v2431_v48 = vrot.slane %v979_v37, %v1724_v8 }
  0xff   : > { %v1065_v19 = vmul.f32 %v2431_v48, %v988_v6  ;;  %v1066_v16 = vmul.f32 %v2431_v48, %v993_v3  ;;  %v1068_v39 = vmul.f32 %v2431_v48, %v1003_v38  ;;  %v1070_v60 = vmul.f32 %v2431_v48, %v1013_v4 }
 0x100   : > { %1337 = vperm.xlu1 %1591, %v2355_v1   ;;  %v1072_v32 = vmul.f32 %v2431_v48, %v1023_v22  ;;  %v1074_v21 = vmul.f32 %v2431_v48, %v1033_v54 }
 0x104   : > { %v1043_v62 = vpop.permute.xlu0 %1042 }
 0x105   : > { %v1076_v13 = vmul.f32 %v2431_v48, %v1043_v62 }
 0x10a   : > { %v2418_v56 = vpop.permute.xlu1 %1047 }
 0x112   : > { %v1053_v9 = vpop.permute.xlu0 %1052 }
 0x113   : > { %v1078_v31 = vmul.f32 %v2431_v48, %v1053_v9  ;;  %v2490_v9 = vrot.slane %v979_v37, %v1734_v11 }
 0x117   : > { %v1082_v47 = vpop.permute.xlu0 %1081 }
 0x118   : > { %v2420_v27 = vpop.permute.xlu1 %1057 }
 0x11b   : > { %v2428_v53 = vpop.permute.xlu0 %1093 }
 0x11d   : > { %v1086_v45 = vpop.permute.xlu1 %1085 }
 0x11e   : > { %v1149_v41 = vmul.f32 %v2426_v18, %v1086_v45  ;;  %v1346_v45 = vsub.s32 3, %v1706_v2 }
 0x11f   : > { %v2435_v40 = vpop.permute.xlu0 %1101 }
 0x120   : > { %v2437_v46 = vadd.f32 %v1149_v41, %v1065_v19  ;;  %v1148_v41 = vmul.f32 %v2426_v18, %v1082_v47  ;;  %v1067_v47 = vmul.f32 %v2431_v48, %v2405_v33 }
 0x121   : > { %v1090_v29 = vpop.permute.xlu1 %1089 }
 0x122   : > { %v1150_v10 = vmul.f32 %v2426_v18, %v1090_v29 }
 0x123   : > { %v2441_v7 = vpop.permute.xlu0 %1109 }
 0x124   : > { %v2443_v12 = vadd.f32 %v1150_v10, %v1066_v16  ;;  %v1064_v16 = vmul.f32 %v2431_v48, %v2397_v63 }
 0x125   : > { %v1098_v8 = vpop.permute.xlu1 %1097 }
 0x126   : > { %v1152_v5 = vmul.f32 %v2426_v18, %v1098_v8  ;;  %v2501_v8 = vrot.slane %v979_v37, %v1346_v45  ;;  %v1164_v11 = vadd.f32 %v1148_v41, %v1064_v16  ;;  %v1073_v16 = vmul.f32 %v2431_v48, %v2414_v49 }
 0x127   : > { %v2447_v20 = vpop.permute.xlu0 %1117 }
 0x128   : > { %v2449_v57 = vadd.f32 %v1152_v5, %v1068_v39  ;;  %v1151_v5 = vmul.f32 %v2426_v18, %v2428_v53  ;;  %v1153_v53 = vmul.f32 %v2426_v18, %v2435_v40 }
 0x129   : > { %v1106_v58 = vpop.permute.xlu1 %1105 }
 0x12a   : > { %v1154_v35 = vmul.f32 %v2426_v18, %v1106_v58  ;;  %v1167_v37 = vadd.f32 %v1151_v5, %v1067_v47 }
 0x12b   : > { %v2453_v42 = vpop.permute.xlu0 %1125 }
 0x12c   : > { %v2455_v0 = vadd.f32 %v1154_v35, %v1070_v60  ;;  %v1159_v5 = vmul.f32 %v2426_v18, %v2453_v42 }
 0x12d   : > { %v1114_v24 = vpop.permute.xlu1 %1113 }
 0x12e   : > { %v1156_v50 = vmul.f32 %v2426_v18, %v1114_v24 }
 0x12f   : > { %v2459_v15 = vpop.permute.xlu0 %1133 }
 0x130   : > { %v2461_v25 = vadd.f32 %v1156_v50, %v1072_v32  ;;  %v1069_v32 = vmul.f32 %v2431_v48, %v2408_v59 }
 0x131   : > { %v1122_v43 = vpop.permute.xlu1 %1121 }
 0x132   : > { %v1158_v1 = vmul.f32 %v2426_v18, %v1122_v43 }
 0x133   : > { %v2465_v26 = vpop.permute.xlu0 %1141 }
 0x134   : > { %v2467_v28 = vadd.f32 %v1158_v1, %v1074_v21 }
 0x135   : > { %v1130_v30 = vpop.permute.xlu1 %1129 }
 0x136   : > { %v1160_v52 = vmul.f32 %v2426_v18, %v1130_v30  ;;  %v1169_v30 = vadd.f32 %v1153_v53, %v1069_v32  ;;  %v1161_v53 = vmul.f32 %v2426_v18, %v2459_v15 }
 0x138   : > { %v1186_v44 = vpop.permute.xlu0 %1185  ;;  %v2471_v61 = vadd.f32 %v1160_v52, %v1076_v13  ;;  %v1155_v13 = vmul.f32 %v2426_v18, %v2441_v7 }
 0x139   : > { %v1138_v34 = vpop.permute.xlu1 %1137  ;;  %v1249_v7 = vmul.f32 %v2490_v9, %v1186_v44 }
 0x13a   : > { %v1162_v51 = vmul.f32 %v2426_v18, %v1138_v34  ;;  %v1071_v34 = vmul.f32 %v2431_v48, %v2412_v55 }
 0x13b   : > { %v1265_v44 = vadd.f32 %v1249_v7, %v2437_v46 }
 0x13c   : > { %v2475_v36 = vpop.permute.xlu0 %1197  ;;  %v2477_v14 = vadd.f32 %v1162_v51, %v1078_v31 }
 0x13e   : > { %v1182_v17 = vpop.permute.xlu1 %1181 }
 0x13f   : > { %v1248_v10 = vmul.f32 %v2490_v9, %v1182_v17 }
 0x140   : > { %v2479_v6 = vpop.permute.xlu0 %1205 }
 0x141   : > { %v1264_v58 = vadd.f32 %v1248_v10, %v1164_v11 }
 0x142   : > { %v2481_v3 = vpop.permute.xlu1 %1189 }
 0x143   : > { %v1250_v49 = vmul.f32 %v2490_v9, %v2481_v3 }
 0x144   : > { %v2483_v38 = vpop.permute.xlu0 %1213 }
 0x146   : > { %v1194_v4 = vpop.permute.xlu1 %1193 }
 0x147   : > { %v1251_v60 = vmul.f32 %v2490_v9, %v1194_v4  ;;  %v1171_v4 = vadd.f32 %v1155_v13, %v1071_v34 }
 0x148   : > { %v2485_v22 = vpop.permute.xlu0 %1221 }
 0x149   : > { %v1267_v50 = vadd.f32 %v1251_v60, %v1167_v37 }
 0x14a   : > { %v1202_v54 = vpop.permute.xlu1 %1201 }
 0x14b   : > { %v1253_v43 = vmul.f32 %v2490_v9, %v1202_v54  ;;  %v1157_v54 = vmul.f32 %v2426_v18, %v2447_v20 }
 0x14c   : > { %v2487_v62 = vpop.permute.xlu0 %1229 }
 0x14d   : > { %v1269_v31 = vadd.f32 %v1253_v43, %v1169_v30  ;;  %v1173_v11 = vadd.f32 %v1157_v54, %v1073_v16 }
 0x14e   : > { %v1210_v19 = vpop.permute.xlu1 %1209 }
 0x14f   : > { %v1255_v59 = vmul.f32 %v2490_v9, %v1210_v19 }
 0x150   : > { %v2496_v29 = vpop.permute.xlu0 %1237 }
 0x151   : > { %v1271_v55 = vadd.f32 %v1255_v59, %v1171_v4 }
 0x152   : > { %v1218_v39 = vpop.permute.xlu1 %1217 }
 0x153   : > { %v1257_v19 = vmul.f32 %v2490_v9, %v1218_v39  ;;  %v1075_v39 = vmul.f32 %v2431_v48, %v2416_v23  ;;  %v1266_v23 = vadd.f32 %v1250_v49, %v2443_v12  ;;  %v1163_v12 = vmul.f32 %v2426_v18, %v2465_v26 }
 0x154   : > { %v1262_v49 = vmul.f32 %v2490_v9, %v2496_v29 }
 0x155   : > { %v1282_v2 = vpop.permute.xlu0 %1281  ;;  %v1273_v60 = vadd.f32 %v1257_v19, %v1173_v11  ;;  %v1175_v46 = vadd.f32 %v1159_v5, %v1075_v39 }
 0x156   : > { %v1348_v35 = vmul.f32 %v2501_v8, %v1282_v2  ;;  %v1226_v63 = vpop.permute.xlu1 %1225  ;;  %v1278_v39 = vadd.f32 %v1262_v49, %v2477_v14 }
 0x158   : > { %v1364_v24 = vadd.f32 %v1348_v35, %v1264_v58  ;;  %v1259_v35 = vmul.f32 %v2490_v9, %v1226_v63 }
 0x159   : > { %v1294_v33 = vpop.permute.xlu0 %1293 }
 0x15a   : > { %1381 = vst.msk [vmem:[%s2512_s12] sm:$0xff] %vm1380_vm4, %v1364_v24  ;;  %v1351_v21 = vmul.f32 %v2501_v8, %v1294_v33  ;;  %v1234_v1 = vpop.permute.xlu1 %1233  ;;  %v1252_v33 = vmul.f32 %v2490_v9, %v2475_v36  ;;  %v1275_v43 = vadd.f32 %v1259_v35, %v1175_v46 }
 0x15c   : > { %v1367_v52 = vadd.f32 %v1351_v21, %v1267_v50  ;;  %v1077_v50 = vmul.f32 %v2431_v48, %v2418_v56  ;;  %v1261_v21 = vmul.f32 %v2490_v9, %v1234_v1  ;;  %v1254_v56 = vmul.f32 %v2490_v9, %v2479_v6 }
 0x15d   : > { %v1302_v40 = vpop.permute.xlu0 %1301 }
 0x15e   : > { %1384 = vst.msk [vmem:[%s2512_s12 + $0x18] sm:$0xff] %vm1380_vm4, %v1367_v52  ;;  %v1353_v51 = vmul.f32 %v2501_v8, %v1302_v40  ;;  %v1242_v17 = vpop.permute.xlu1 %1241  ;;  %v1177_v30 = vadd.f32 %v1161_v53, %v1077_v50  ;;  %v1268_v40 = vadd.f32 %v1252_v33, %v2449_v57  ;;  %v1270_v54 = vadd.f32 %v1254_v56, %v2455_v0 }
 0x15f   : > { %v1263_v18 = vmul.f32 %v2490_v9, %v1242_v17 }
 0x160   : > { %v1369_v45 = vadd.f32 %v1353_v51, %v1269_v31  ;;  %v1079_v31 = vmul.f32 %v2431_v48, %v2420_v27  ;;  %v1277_v59 = vadd.f32 %v1261_v21, %v1177_v30 }
 0x161   : > { %v1310_v41 = vpop.permute.xlu0 %1309 }
 0x162   : > { %1386 = vst.msk [vmem:[%s2512_s12 + $0x28] sm:$0xff] %vm1380_vm4, %v1369_v45  ;;  %v1355_v10 = vmul.f32 %v2501_v8, %v1310_v41  ;;  %v1179_v51 = vadd.f32 %v1163_v12, %v1079_v31  ;;  %v1256_v45 = vmul.f32 %v2490_v9, %v2483_v38  ;;  %v1258_v38 = vmul.f32 %v2490_v9, %v2485_v22 }
 0x163   : > { %v1286_v20 = vpop.permute.xlu1 %1285 }
 0x164   : > { %v1371_v2 = vadd.f32 %v1355_v10, %v1271_v55  ;;  %v1349_v47 = vmul.f32 %v2501_v8, %v1286_v20  ;;  %v1279_v17 = vadd.f32 %v1263_v18, %v1179_v51  ;;  %v1272_v0 = vadd.f32 %v1256_v45, %v2461_v25 }
 0x165   : > { %v1318_v58 = vpop.permute.xlu0 %1317  ;;  %v1274_v5 = vadd.f32 %v1258_v38, %v2467_v28  ;;  %v1260_v20 = vmul.f32 %v2490_v9, %v2487_v62 }
 0x166   : > { %1388 = vst.msk [vmem:[%s2512_s12 + $0x38] sm:$0xff] %vm1380_vm4, %v1371_v2  ;;  %v1357_v42 = vmul.f32 %v2501_v8, %v1318_v58  ;;  %v1365_v37 = vadd.f32 %v1349_v47, %v1265_v44 }
 0x167   : > { %v1290_v3 = vpop.permute.xlu1 %1289  ;;  %v1276_v44 = vadd.f32 %v1260_v20, %v2471_v61 }
 0x168   : > { %v1373_v24 = vadd.f32 %v1357_v42, %v1273_v60  ;;  %1382 = vst.msk [vmem:[%s2512_s12 + $0x8] sm:$0xff] %vm1380_vm4, %v1365_v37  ;;  %v1350_v63 = vmul.f32 %v2501_v8, %v1290_v3 }
 0x169   : > { %v1326_v32 = vpop.permute.xlu0 %1325 }
 0x16a   : > { %1390 = vst.msk [vmem:[%s2512_s12 + $0x48] sm:$0xff] %vm1380_vm4, %v1373_v24  ;;  %v1359_v15 = vmul.f32 %v2501_v8, %v1326_v32  ;;  %v1366_v36 = vadd.f32 %v1350_v63, %v1266_v23 }
 0x16b   : > { %v1298_v13 = vpop.permute.xlu1 %1297 }
 0x16c   : > { %v1375_v52 = vadd.f32 %v1359_v15, %v1275_v43  ;;  %1383 = vst.msk [vmem:[%s2512_s12 + $0x10] sm:$0xff] %vm1380_vm4, %v1366_v36  ;;  %v1352_v1 = vmul.f32 %v2501_v8, %v1298_v13 }
 0x16d   : > { %v1334_v34 = vpop.permute.xlu0 %1333 }
 0x16e   : > { %1392 = vst.msk [vmem:[%s2512_s12 + $0x58] sm:$0xff] %vm1380_vm4, %v1375_v52  ;;  %v1361_v57 = vmul.f32 %v2501_v8, %v1334_v34  ;;  %v1368_v26 = vadd.f32 %v1352_v1, %v1268_v40 }
 0x16f   : > { %v1306_v6 = vpop.permute.xlu1 %1305 }
 0x170   : > { %v1377_v4 = vadd.f32 %v1361_v57, %v1277_v59  ;;  %1385 = vst.msk [vmem:[%s2512_s12 + $0x20] sm:$0xff] %vm1380_vm4, %v1368_v26  ;;  %v1354_v27 = vmul.f32 %v2501_v8, %v1306_v6 }
 0x171   : > { %v1342_v48 = vpop.permute.xlu0 %1341 }
 0x172   : > { %1394 = vst.msk [vmem:[%s2512_s12 + $0x68] sm:$0xff] %vm1380_vm4, %v1377_v4  ;;  %v1363_v7 = vmul.f32 %v2501_v8, %v1342_v48  ;;  %v1370_v41 = vadd.f32 %v1354_v27, %v1270_v54 }
 0x173   : > { %v1314_v16 = vpop.permute.xlu1 %1313 }
 0x174   : > { %v1379_v55 = vadd.f32 %v1363_v7, %v1279_v17  ;;  %1387 = vst.msk [vmem:[%s2512_s12 + $0x30] sm:$0xff] %vm1380_vm4, %v1370_v41  ;;  %v1356_v19 = vmul.f32 %v2501_v8, %v1314_v16 }
 0x176   : > { %1396 = vst.msk [vmem:[%s2512_s12 + $0x78] sm:$0xff] %vm1380_vm4, %v1379_v55  ;;  %v1372_v10 = vadd.f32 %v1356_v19, %v1272_v0 }
 0x177   : > { %v1322_v11 = vpop.permute.xlu1 %1321 }
 0x178   : > { %1389 = vst.msk [vmem:[%s2512_s12 + $0x40] sm:$0xff] %vm1380_vm4, %v1372_v10  ;;  %v1358_v25 = vmul.f32 %v2501_v8, %v1322_v11 }
 0x17a   : > { %v1374_v22 = vadd.f32 %v1358_v25, %v1274_v5 }
 0x17b   : > { %v1330_v2 = vpop.permute.xlu1 %1329 }
 0x17c   : > { %1391 = vst.msk [vmem:[%s2512_s12 + $0x50] sm:$0xff] %vm1380_vm4, %v1374_v22  ;;  %v1360_v47 = vmul.f32 %v2501_v8, %v1330_v2 }
 0x17e   : > { %v1376_v28 = vadd.f32 %v1360_v47, %v1276_v44 }
 0x17f   : > { %v1338_v58 = vpop.permute.xlu1 %1337 }
 0x180   : > { %1393 = vst.msk [vmem:[%s2512_s12 + $0x60] sm:$0xff] %vm1380_vm4, %v1376_v28  ;;  %v1362_v62 = vmul.f32 %v2501_v8, %v1338_v58 }
 0x182   : > { %v1378_v60 = vadd.f32 %v1362_v62, %v1278_v39 }
 0x184   : > { %1395 = vst.msk [vmem:[%s2512_s12 + $0x70] sm:$0xff] %vm1380_vm4, %v1378_v60 }
 0x185 PF: > { %s15_s22 = sadd.s32 1, %s1630_s22   ;;  %s2635_s18 = smov %s1622_s20 }
 0x186   : > { %p12_p8 = scmp.ge.s32.totalorder %s15_s22, 6   ;;  %s2636_s19 = smov %s1626_s21 }
 0x187   : > { %s2637_s20 = smov %s2640_s23  ;;  %s2638_s21 = smov %s2644_s24 }
 0x188   :  { %14 = sbr.rel (!%p12_p8) target bundleno = 3 (0x3), region = 76 }

</bundles_post_ra>
